<compile_context>
chip_gen: v7x
topology: tpu7x:2x2x1
jax: 0.10.0
libtpu: 0.0.40
codegen_flags: <defaults>
</compile_context>

<pallas_src>
import functools
import math

import jax
import jax.numpy as jnp
import numpy as np
from jax.experimental import pallas as pl
from jax.experimental.pallas import tpu as pltpu

BN_EPS = 1e-5
LEAKY_SLOPE = 0.01           # PyTorch nn.LeakyReLU default negative_slope
LANE = 128


def _conv_stats_kernel(x_ref, w_ref, conv_ref, sum_ref, ssq_ref, stage_ref, lhs_ref, *,
                       b_blk, h_out, w_out, wq, c_in, c_out, ksize, stride, n_wc):
    """Pass 1: conv via ONE matmul per block + per-channel batch stats + compact conv store."""
    sc = stride * c_in
    m = b_blk * h_out * w_out

    @pl.when(pl.program_id(1) == 0)
    def _init():
        sum_ref[...] = jnp.zeros_like(sum_ref)
        ssq_ref[...] = jnp.zeros_like(ssq_ref)

    # Stage the bf16 block to f32 once; all sub-lane slicing below happens on the f32 copy.
    stage_ref[...] = x_ref[...].astype(jnp.float32)

    # Assemble the matmul LHS once per block from k*n_wc large contiguous slabs.
    # Slab (ki, a) holds input rows h = ho*stride + ki and folded-W chunks wb = wo + a, i.e. the
    # data for W taps kj in [a*stride, (a+1)*stride); columns with kj >= ksize have zero rows in
    # w_ref and contribute nothing.
    for ki in range(ksize):
        di, pi = ki // stride, ki % stride
        for a in range(n_wc):
            j = ki * n_wc + a
            slab = stage_ref[:, di:di + h_out, pi * wq + a:pi * wq + a + w_out, :]
            lhs_ref[:, j * sc:(j + 1) * sc] = slab.astype(jnp.bfloat16).reshape(m, sc)

    # Single MXU matmul: (M, K=k*n_wc*s*c_in) @ (K, c_pad), f32 accumulation.
    conv = jnp.dot(lhs_ref[...], w_ref[...], preferred_element_type=jnp.float32)

    sum_ref[...] += jnp.sum(conv, axis=0, keepdims=True).reshape(sum_ref.shape)
    ssq_ref[...] += jnp.sum(conv * conv, axis=0, keepdims=True).reshape(ssq_ref.shape)
    # Compact store: only the real C_out channels go to HBM (no 128-lane padding of the
    # intermediate tensor).
    conv_ref[...] = conv[:, :c_out].reshape(b_blk, h_out * w_out, c_out)


def _bn_act_kernel(conv_ref, scale_ref, shift_ref, out_ref):
    """Pass 2: elementwise BN affine + LeakyReLU on the lane-dense compact conv tensor."""
    y = conv_ref[...] * scale_ref[...] + shift_ref[...]
    out_ref[...] = jnp.where(y >= 0, y, LEAKY_SLOPE * y).astype(out_ref.dtype)


@functools.partial(jax.jit,
                   static_argnames=("stride", "kernel_size", "padding", "block_images"))
def down_sample(x_nchw, weight, bias, gamma, beta, *, stride, kernel_size=3, padding=1,
                block_images=None):
    """Pallas implementation of DownSalmpe.forward.

    x_nchw: (N, C_in, H, W); weight: (C_out, C_in, kH, kW); bias/gamma/beta: (C_out,).
    Returns (N, C_out, H_out, W_out).  Conv bias is dropped: it is exactly cancelled by
    train-mode BatchNorm's batch-mean subtraction (eval-mode running stats would need it back).
    """
    del bias

    n, c_in, h, w = x_nchw.shape
    c_out = weight.shape[0]
    k, s, p = kernel_size, stride, padding
    h_out = (h + 2 * p - k) // s + 1
    w_out = (w + 2 * p - k) // s + 1
    m_img = h_out * w_out
    m_total = n * m_img
    c_pad = ((c_out + LANE - 1) // LANE) * LANE
    n_wc = (k - 1) // s + 1                  # folded-W chunks touched per output pixel
    kdim = k * n_wc * s * c_in               # matmul contraction depth (incl. zero-weight cols)

    # Image-block size: multi-image blocks fill the MXU M dim and amortize grid-step overhead.
    if block_images is None:
        block_images = 1
        for cand in (16, 8, 4, 2, 1):
            if n % cand == 0:
                block_images = cand
                break
    b_blk = block_images
    assert n % b_blk == 0, "batch must be divisible by block_images"
    n_blocks = n // b_blk
    n_split = 2 if n_blocks % 2 == 0 else 1  # v7x: shard pass-1 stats over both TensorCores
    nbps = n_blocks // n_split

    # ---- input prep: NCHW->NHWC, bf16 cast, zero-pad, stride-fold (pure reshapes) -----------
    # XLA fuses transpose + cast + pad + reshape into a single HBM pass over the input.
    hq = max(-(-(h + 2 * p) // s), h_out + (k - 1) // s)
    wq = max(-(-(w + 2 * p) // s), w_out + n_wc - 1)
    assert hq >= h_out + (k - 1) // s and wq >= w_out + n_wc - 1   # slab bounds always in range
    x_nhwc = jnp.transpose(x_nchw, (0, 2, 3, 1)).astype(jnp.bfloat16)
    xp = jnp.pad(x_nhwc, ((0, 0), (p, hq * s - h - p), (p, wq * s - w - p), (0, 0)))
    # element [b, hb, hp*wq + wb, wp*c_in + ci] == padded[b, hb*s + hp, wb*s + wp, ci]
    xs = xp.reshape(n, hq, s, wq, s, c_in).reshape(n, hq, s * wq, s * c_in)

    # ---- weight prep: (C_out, C_in, kH, kW) -> (kdim, c_pad) with zero non-tap rows ---------
    w_taps = jnp.transpose(weight, (2, 3, 1, 0)).astype(jnp.float32)        # (k, k, c_in, c_out)
    w_taps = jnp.pad(w_taps, ((0, 0), (0, n_wc * s - k), (0, 0), (0, 0)))   # zero rows kj >= k
    w_mat = w_taps.reshape(kdim, c_out)
    w_mat = jnp.pad(w_mat, ((0, 0), (0, c_pad - c_out))).astype(jnp.bfloat16)

    # ---- pass 1: conv (one matmul / block) + batch statistics + compact conv store ----------
    m_blk = b_blk * m_img
    kern1 = functools.partial(
        _conv_stats_kernel, b_blk=b_blk, h_out=h_out, w_out=w_out, wq=wq, c_in=c_in,
        c_out=c_out, ksize=k, stride=s, n_wc=n_wc)
    conv_c, ch_sum, ch_ssq = pl.pallas_call(
        kern1,
        out_shape=(jax.ShapeDtypeStruct((n, m_img, c_out), jnp.float32),
                   jax.ShapeDtypeStruct((n_split, 1, c_pad), jnp.float32),
                   jax.ShapeDtypeStruct((n_split, 1, c_pad), jnp.float32)),
        grid=(n_split, nbps),
        in_specs=[pl.BlockSpec((b_blk, hq, s * wq, s * c_in),
                               lambda sp, i: (sp * nbps + i, 0, 0, 0)),
                  pl.BlockSpec((kdim, c_pad), lambda sp, i: (0, 0))],
        out_specs=(pl.BlockSpec((b_blk, m_img, c_out), lambda sp, i: (sp * nbps + i, 0, 0)),
                   pl.BlockSpec((1, 1, c_pad), lambda sp, i: (sp, 0, 0)),
                   pl.BlockSpec((1, 1, c_pad), lambda sp, i: (sp, 0, 0))),
        scratch_shapes=[pltpu.VMEM((b_blk, hq, s * wq, s * c_in), jnp.float32),
                        pltpu.VMEM((m_blk, kdim), jnp.bfloat16)],
        compiler_params=pltpu.CompilerParams(
            dimension_semantics=("parallel", "arbitrary")),
        cost_estimate=pl.CostEstimate(
            flops=2 * m_total * kdim * c_pad, transcendentals=0,
            bytes_accessed=xs.size * 2 + w_mat.size * 2 + m_total * c_out * 4),
    )(xs, w_mat)

    # ---- finalize train-mode BN into per-channel scale/shift (tiny f32 rows) ----------------
    tot_sum = jnp.sum(ch_sum[:, 0, :c_out], axis=0)
    tot_ssq = jnp.sum(ch_ssq[:, 0, :c_out], axis=0)
    mean = tot_sum / m_total
    var = jnp.maximum(tot_ssq / m_total - mean * mean, 0.0)     # biased variance (training BN)
    scale = gamma.astype(jnp.float32) * jax.lax.rsqrt(var + BN_EPS)
    shift = beta.astype(jnp.float32) - mean * scale
    feat = m_img * c_out
    scale_t = jnp.tile(scale, m_img).reshape(1, feat)           # element q -> scale[q % c_out]
    shift_t = jnp.tile(shift, m_img).reshape(1, feat)

    # ---- pass 2: elementwise BN affine + LeakyReLU over the lane-dense compact conv ---------
    conv_flat = conv_c.reshape(n, feat)                         # metadata-only reshape
    b2 = min(n, 8) if n % 8 == 0 else n
    out_flat = pl.pallas_call(
        _bn_act_kernel,
        out_shape=jax.ShapeDtypeStruct((n, feat), jnp.float32),
        grid=(n // b2,),
        in_specs=[pl.BlockSpec((b2, feat), lambda i: (i, 0)),
                  pl.BlockSpec((1, feat), lambda i: (0, 0)),
                  pl.BlockSpec((1, feat), lambda i: (0, 0))],
        out_specs=pl.BlockSpec((b2, feat), lambda i: (i, 0)),
        compiler_params=pltpu.CompilerParams(dimension_semantics=("parallel",)),
    )(conv_flat, scale_t, shift_t)

    out_nhwc = out_flat.reshape(n, h_out, w_out, c_out)
    # TODO(synk): emit channel-major output blocks from pass 2 to drop this final transpose.
    return jnp.transpose(out_nhwc, (0, 3, 1, 2)).astype(x_nchw.dtype)


def _reference(x_nchw, weight, bias, gamma, beta, *, stride, kernel_size, padding):
    """Pure-JAX f32 reference matching PyTorch training-mode semantics."""
    conv = jax.lax.conv_general_dilated(
        x_nchw.astype(jnp.float32), weight.astype(jnp.float32),
        window_strides=(stride, stride),
        padding=[(padding, padding), (padding, padding)],
        dimension_numbers=("NCHW", "OIHW", "NCHW"),
    ) + bias.reshape(1, -1, 1, 1).astype(jnp.float32)
    mean = jnp.mean(conv, axis=(0, 2, 3), keepdims=True)
    var = jnp.mean((conv - mean) ** 2, axis=(0, 2, 3), keepdims=True)
    xhat = (conv - mean) / jnp.sqrt(var + BN_EPS)
    y = xhat * gamma.reshape(1, -1, 1, 1) + beta.reshape(1, -1, 1, 1)
    return jnp.where(y >= 0, y, LEAKY_SLOPE * y)


def _run_case(key, n, c_in, h, w, c_out, stride, ksize, pad, block_images=None):
    kx, kw, kb, kg, kbe = jax.random.split(key, 5)
    x = jax.random.normal(kx, (n, c_in, h, w), dtype=jnp.float32)
    fan_in = c_in * ksize * ksize
    bound = 1.0 / math.sqrt(fan_in)
    weight = jax.random.uniform(kw, (c_out, c_in, ksize, ksize), minval=-bound,
                                maxval=bound, dtype=jnp.float32)
    bias = jax.random.uniform(kb, (c_out,), minval=-bound, maxval=bound, dtype=jnp.float32)
    gamma = 0.5 + jax.random.uniform(kg, (c_out,), dtype=jnp.float32)
    beta = 0.1 * jax.random.normal(kbe, (c_out,), dtype=jnp.float32)

    out = down_sample(x, weight, bias, gamma, beta, stride=stride, kernel_size=ksize,
                      padding=pad, block_images=block_images)
    out = jax.block_until_ready(out)
    ref = _reference(x, weight, bias, gamma, beta, stride=stride, kernel_size=ksize,
                     padding=pad)
    assert out.shape == ref.shape, (out.shape, ref.shape)
    # bf16 matmul inputs (f32 accumulation) vs an all-f32 reference -> ~1e-2 scale agreement.
    np.testing.assert_allclose(np.asarray(out), np.asarray(ref), atol=5e-2, rtol=5e-2)


if __name__ == "__main__":
    root = jax.random.PRNGKey(0)
    k1, k2 = jax.random.split(root)
    # Module config: DownSalmpe(input_nc=4, output_nc=8, stride=2, kernel_size=3, padding=1)
    _run_case(k1, n=2, c_in=4, h=16, w=16, c_out=8, stride=2, ksize=3, pad=1)
    # Larger batch: exercises multi-image blocks, the split ("parallel") pass-1 stats reduction
    # (feeds both v7x TensorCores) and accumulation across the "arbitrary" grid axis.
    _run_case(k2, n=8, c_in=4, h=16, w=16, c_out=8, stride=2, ksize=3, pad=1, block_images=2)
    print("KERNEL_OK")
</pallas_src>

<mosaic_0001>
module attributes {stable_mosaic.version = 11 : i64} {
  func.func @_conv_stats_kernel(%arg0: i32, %arg1: i32, %arg2: memref<2x9x18x8xbf16, #tpu.memory_space<vmem>>, %arg3: memref<48x128xbf16, #tpu.memory_space<vmem>>, %arg4: memref<2x64x8xf32, #tpu.memory_space<vmem>>, %arg5: memref<1x1x128xf32, #tpu.memory_space<vmem>>, %arg6: memref<1x1x128xf32, #tpu.memory_space<vmem>>, %arg7: memref<2x9x18x8xf32, #tpu.memory_space<vmem>>, %arg8: memref<128x48xbf16, #tpu.memory_space<vmem>>) attributes {dimension_semantics = [#tpu.dimension_semantics<parallel>, #tpu.dimension_semantics<arbitrary>], iteration_bounds = array<i64: 1, 1>, scalar_prefetch = 0 : i64, scratch_operands = 2 : i64, tpu.core_type = #tpu.core_type<tc>, window_params = [{transform_indices = @transform_0, window_bounds = array<i64: 2, 9, 18, 8>}, {pipeline_mode = #tpu.pipeline_mode<synchronous>, transform_indices = @transform_1, window_bounds = array<i64: 48, 128>}, {transform_indices = @transform_2, window_bounds = array<i64: 2, 64, 8>}, {transform_indices = @transform_3, window_bounds = array<i64: 1, 1, 128>}, {transform_indices = @transform_4, window_bounds = array<i64: 1, 1, 128>}]} {
    %c0_i32 = arith.constant 0 : i32
    %0 = arith.cmpi eq, %arg1, %c0_i32 : i32
    %1 = arith.extui %0 : i1 to i32
    %c0_i32_0 = arith.constant 0 : i32
    %2 = arith.cmpi ne, %1, %c0_i32_0 : i32
    scf.if %2 {
      %cst_57 = arith.constant 0.000000e+00 : f32
      %49 = vector.broadcast %cst_57 : f32 to vector<1x1x128xf32>
      %c0_58 = arith.constant 0 : index
      %c0_59 = arith.constant 0 : index
      %c0_60 = arith.constant 0 : index
      %50 = vector.load %arg5[%c0_58, %c0_59, %c0_60] : memref<1x1x128xf32, #tpu.memory_space<vmem>>, vector<1x1x128xf32>
      tpu.vector_store %arg5[%c0_58, %c0_59, %c0_60], %49 {strides = array<i32>} : memref<1x1x128xf32, #tpu.memory_space<vmem>>, vector<1x1x128xf32>,
      %cst_61 = arith.constant 0.000000e+00 : f32
      %51 = vector.broadcast %cst_61 : f32 to vector<1x1x128xf32>
      %c0_62 = arith.constant 0 : index
      %c0_63 = arith.constant 0 : index
      %c0_64 = arith.constant 0 : index
      %52 = vector.load %arg6[%c0_62, %c0_63, %c0_64] : memref<1x1x128xf32, #tpu.memory_space<vmem>>, vector<1x1x128xf32>
      tpu.vector_store %arg6[%c0_62, %c0_63, %c0_64], %51 {strides = array<i32>} : memref<1x1x128xf32, #tpu.memory_space<vmem>>, vector<1x1x128xf32>,
    } else {
    }
    %c0 = arith.constant 0 : index
    %c0_1 = arith.constant 0 : index
    %c0_2 = arith.constant 0 : index
    %c0_3 = arith.constant 0 : index
    %3 = vector.load %arg2[%c0, %c0_1, %c0_2, %c0_3] : memref<2x9x18x8xbf16, #tpu.memory_space<vmem>>, vector<2x9x18x8xbf16>
    %4 = arith.extf %3 : vector<2x9x18x8xbf16> to vector<2x9x18x8xf32>
    %c0_4 = arith.constant 0 : index
    %c0_5 = arith.constant 0 : index
    %c0_6 = arith.constant 0 : index
    %c0_7 = arith.constant 0 : index
    %5 = vector.load %arg7[%c0_4, %c0_5, %c0_6, %c0_7] : memref<2x9x18x8xf32, #tpu.memory_space<vmem>>, vector<2x9x18x8xf32>
    tpu.vector_store %arg7[%c0_4, %c0_5, %c0_6, %c0_7], %4 {strides = array<i32>} : memref<2x9x18x8xf32, #tpu.memory_space<vmem>>, vector<2x9x18x8xf32>,
    %c0_8 = arith.constant 0 : index
    %c0_9 = arith.constant 0 : index
    %c0_10 = arith.constant 0 : index
    %c0_11 = arith.constant 0 : index
    %6 = vector.load %arg7[%c0_8, %c0_9, %c0_10, %c0_11] : memref<2x9x18x8xf32, #tpu.memory_space<vmem>>, vector<2x8x8x8xf32>
    %7 = arith.truncf %6 : vector<2x8x8x8xf32> to vector<2x8x8x8xbf16>
    %8 = vector.shape_cast %7 : vector<2x8x8x8xbf16> to vector<128x8xbf16>
    %c0_12 = arith.constant 0 : index
    %c0_13 = arith.constant 0 : index
    %9 = vector.load %arg8[%c0_12, %c0_13] : memref<128x48xbf16, #tpu.memory_space<vmem>>, vector<128x8xbf16>
    tpu.vector_store %arg8[%c0_12, %c0_13], %8 {strides = array<i32>} : memref<128x48xbf16, #tpu.memory_space<vmem>>, vector<128x8xbf16>,
    %c0_14 = arith.constant 0 : index
    %c0_15 = arith.constant 0 : index
    %c1 = arith.constant 1 : index
    %c0_16 = arith.constant 0 : index
    %10 = vector.load %arg7[%c0_14, %c0_15, %c1, %c0_16] : memref<2x9x18x8xf32, #tpu.memory_space<vmem>>, vector<2x8x8x8xf32>
    %11 = arith.truncf %10 : vector<2x8x8x8xf32> to vector<2x8x8x8xbf16>
    %12 = vector.shape_cast %11 : vector<2x8x8x8xbf16> to vector<128x8xbf16>
    %c0_17 = arith.constant 0 : index
    %c8 = arith.constant 8 : index
    %13 = vector.load %arg8[%c0_17, %c8] : memref<128x48xbf16, #tpu.memory_space<vmem>>, vector<128x8xbf16>
    tpu.vector_store %arg8[%c0_17, %c8], %12 {strides = array<i32>} : memref<128x48xbf16, #tpu.memory_space<vmem>>, vector<128x8xbf16>,
    %c0_18 = arith.constant 0 : index
    %c0_19 = arith.constant 0 : index
    %c9 = arith.constant 9 : index
    %c0_20 = arith.constant 0 : index
    %14 = vector.load %arg7[%c0_18, %c0_19, %c9, %c0_20] : memref<2x9x18x8xf32, #tpu.memory_space<vmem>>, vector<2x8x8x8xf32>
    %15 = arith.truncf %14 : vector<2x8x8x8xf32> to vector<2x8x8x8xbf16>
    %16 = vector.shape_cast %15 : vector<2x8x8x8xbf16> to vector<128x8xbf16>
    %c0_21 = arith.constant 0 : index
    %c16 = arith.constant 16 : index
    %17 = vector.load %arg8[%c0_21, %c16] : memref<128x48xbf16, #tpu.memory_space<vmem>>, vector<128x8xbf16>
    tpu.vector_store %arg8[%c0_21, %c16], %16 {strides = array<i32>} : memref<128x48xbf16, #tpu.memory_space<vmem>>, vector<128x8xbf16>,
    %c0_22 = arith.constant 0 : index
    %c0_23 = arith.constant 0 : index
    %c10 = arith.constant 10 : index
    %c0_24 = arith.constant 0 : index
    %18 = vector.load %arg7[%c0_22, %c0_23, %c10, %c0_24] : memref<2x9x18x8xf32, #tpu.memory_space<vmem>>, vector<2x8x8x8xf32>
    %19 = arith.truncf %18 : vector<2x8x8x8xf32> to vector<2x8x8x8xbf16>
    %20 = vector.shape_cast %19 : vector<2x8x8x8xbf16> to vector<128x8xbf16>
    %c0_25 = arith.constant 0 : index
    %c24 = arith.constant 24 : index
    %21 = vector.load %arg8[%c0_25, %c24] : memref<128x48xbf16, #tpu.memory_space<vmem>>, vector<128x8xbf16>
    tpu.vector_store %arg8[%c0_25, %c24], %20 {strides = array<i32>} : memref<128x48xbf16, #tpu.memory_space<vmem>>, vector<128x8xbf16>,
    %c0_26 = arith.constant 0 : index
    %c1_27 = arith.constant 1 : index
    %c0_28 = arith.constant 0 : index
    %c0_29 = arith.constant 0 : index
    %22 = vector.load %arg7[%c0_26, %c1_27, %c0_28, %c0_29] : memref<2x9x18x8xf32, #tpu.memory_space<vmem>>, vector<2x8x8x8xf32>
    %23 = arith.truncf %22 : vector<2x8x8x8xf32> to vector<2x8x8x8xbf16>
    %24 = vector.shape_cast %23 : vector<2x8x8x8xbf16> to vector<128x8xbf16>
    %c0_30 = arith.constant 0 : index
    %c32 = arith.constant 32 : index
    %25 = vector.load %arg8[%c0_30, %c32] : memref<128x48xbf16, #tpu.memory_space<vmem>>, vector<128x8xbf16>
    tpu.vector_store %arg8[%c0_30, %c32], %24 {strides = array<i32>} : memref<128x48xbf16, #tpu.memory_space<vmem>>, vector<128x8xbf16>,
    %c0_31 = arith.constant 0 : index
    %c1_32 = arith.constant 1 : index
    %c1_33 = arith.constant 1 : index
    %c0_34 = arith.constant 0 : index
    %26 = vector.load %arg7[%c0_31, %c1_32, %c1_33, %c0_34] : memref<2x9x18x8xf32, #tpu.memory_space<vmem>>, vector<2x8x8x8xf32>
    %27 = arith.truncf %26 : vector<2x8x8x8xf32> to vector<2x8x8x8xbf16>
    %28 = vector.shape_cast %27 : vector<2x8x8x8xbf16> to vector<128x8xbf16>
    %c0_35 = arith.constant 0 : index
    %c40 = arith.constant 40 : index
    %29 = vector.load %arg8[%c0_35, %c40] : memref<128x48xbf16, #tpu.memory_space<vmem>>, vector<128x8xbf16>
    tpu.vector_store %arg8[%c0_35, %c40], %28 {strides = array<i32>} : memref<128x48xbf16, #tpu.memory_space<vmem>>, vector<128x8xbf16>,
    %c0_36 = arith.constant 0 : index
    %c0_37 = arith.constant 0 : index
    %30 = vector.load %arg8[%c0_36, %c0_37] : memref<128x48xbf16, #tpu.memory_space<vmem>>, vector<128x48xbf16>
    %c0_38 = arith.constant 0 : index
    %c0_39 = arith.constant 0 : index
    %31 = vector.load %arg3[%c0_38, %c0_39] : memref<48x128xbf16, #tpu.memory_space<vmem>>, vector<48x128xbf16>
    %cst = arith.constant dense<0.000000e+00> : vector<128x128xf32>
    %32 = tpu.matmul %30, %31, %cst {dimension_numbers = #tpu.dot_dimension_numbers<[1], [0], [0], [1], [0, 0, 1, 1], [], []>} : vector<128x48xbf16>, vector<48x128xbf16>, vector<128x128xf32> -> vector<128x128xf32>
    %c0_40 = arith.constant 0 : index
    %c0_41 = arith.constant 0 : index
    %c0_42 = arith.constant 0 : index
    %33 = vector.load %arg5[%c0_40, %c0_41, %c0_42] : memref<1x1x128xf32, #tpu.memory_space<vmem>>, vector<1x1x128xf32>
    %cst_43 = arith.constant dense<0.000000e+00> : vector<128xf32>
    %34 = vector.multi_reduction <add>, %32, %cst_43 [0] : vector<128x128xf32> to vector<128xf32>
    %35 = vector.shape_cast %34 : vector<128xf32> to vector<1x128xf32>
    %36 = vector.shape_cast %35 : vector<1x128xf32> to vector<1x1x128xf32>
    %37 = arith.addf %33, %36 : vector<1x1x128xf32>
    %c0_44 = arith.constant 0 : index
    %c0_45 = arith.constant 0 : index
    %c0_46 = arith.constant 0 : index
    %38 = vector.load %arg5[%c0_44, %c0_45, %c0_46] : memref<1x1x128xf32, #tpu.memory_space<vmem>>, vector<1x1x128xf32>
    tpu.vector_store %arg5[%c0_44, %c0_45, %c0_46], %37 {strides = array<i32>} : memref<1x1x128xf32, #tpu.memory_space<vmem>>, vector<1x1x128xf32>,
    %c0_47 = arith.constant 0 : index
    %c0_48 = arith.constant 0 : index
    %c0_49 = arith.constant 0 : index
    %39 = vector.load %arg6[%c0_47, %c0_48, %c0_49] : memref<1x1x128xf32, #tpu.memory_space<vmem>>, vector<1x1x128xf32>
    %40 = arith.mulf %32, %32 : vector<128x128xf32>
    %cst_50 = arith.constant dense<0.000000e+00> : vector<128xf32>
    %41 = vector.multi_reduction <add>, %40, %cst_50 [0] : vector<128x128xf32> to vector<128xf32>
    %42 = vector.shape_cast %41 : vector<128xf32> to vector<1x128xf32>
    %43 = vector.shape_cast %42 : vector<1x128xf32> to vector<1x1x128xf32>
    %44 = arith.addf %39, %43 : vector<1x1x128xf32>
    %c0_51 = arith.constant 0 : index
    %c0_52 = arith.constant 0 : index
    %c0_53 = arith.constant 0 : index
    %45 = vector.load %arg6[%c0_51, %c0_52, %c0_53] : memref<1x1x128xf32, #tpu.memory_space<vmem>>, vector<1x1x128xf32>
    tpu.vector_store %arg6[%c0_51, %c0_52, %c0_53], %44 {strides = array<i32>} : memref<1x1x128xf32, #tpu.memory_space<vmem>>, vector<1x1x128xf32>,
    %46 = vector.extract_strided_slice %32 {offsets = [0, 0], sizes = [128, 8], strides = [1, 1]} : vector<128x128xf32> to vector<128x8xf32>
    %47 = vector.shape_cast %46 : vector<128x8xf32> to vector<2x64x8xf32>
    %c0_54 = arith.constant 0 : index
    %c0_55 = arith.constant 0 : index
    %c0_56 = arith.constant 0 : index
    %48 = vector.load %arg4[%c0_54, %c0_55, %c0_56] : memref<2x64x8xf32, #tpu.memory_space<vmem>>, vector<2x64x8xf32>
    tpu.vector_store %arg4[%c0_54, %c0_55, %c0_56], %47 {strides = array<i32>} : memref<2x64x8xf32, #tpu.memory_space<vmem>>, vector<2x64x8xf32>,
    return
  }
  func.func @transform_0(%arg0: i32, %arg1: i32) -> (i32, i32, i32, i32) {
    %c1_i32 = arith.constant 1 : i32
    %0 = arith.muli %arg0, %c1_i32 : i32
    %1 = arith.addi %0, %arg1 : i32
    %c0_i32 = arith.constant 0 : i32
    %c0_i32_0 = arith.constant 0 : i32
    %c0_i32_1 = arith.constant 0 : i32
    %c0_i32_2 = arith.constant 0 : i32
    return %1, %c0_i32, %c0_i32_0, %c0_i32_1 : i32, i32, i32, i32
  }
  func.func @transform_1(%arg0: i32, %arg1: i32) -> (i32, i32) {
    %c0_i32 = arith.constant 0 : i32
    %c0_i32_0 = arith.constant 0 : i32
    %c0_i32_1 = arith.constant 0 : i32
    return %c0_i32, %c0_i32_0 : i32, i32
  }
  func.func @transform_2(%arg0: i32, %arg1: i32) -> (i32, i32, i32) {
    %c1_i32 = arith.constant 1 : i32
    %0 = arith.muli %arg0, %c1_i32 : i32
    %1 = arith.addi %0, %arg1 : i32
    %c0_i32 = arith.constant 0 : i32
    %c0_i32_0 = arith.constant 0 : i32
    %c0_i32_1 = arith.constant 0 : i32
    return %1, %c0_i32, %c0_i32_0 : i32, i32, i32
  }
  func.func @transform_3(%arg0: i32, %arg1: i32) -> (i32, i32, i32) {
    %c0_i32 = arith.constant 0 : i32
    %c0_i32_0 = arith.constant 0 : i32
    %c0_i32_1 = arith.constant 0 : i32
    return %arg0, %c0_i32, %c0_i32_0 : i32, i32, i32
  }
  func.func @transform_4(%arg0: i32, %arg1: i32) -> (i32, i32, i32) {
    %c0_i32 = arith.constant 0 : i32
    %c0_i32_0 = arith.constant 0 : i32
    %c0_i32_1 = arith.constant 0 : i32
    return %arg0, %c0_i32, %c0_i32_0 : i32, i32, i32
  }
}

module attributes {stable_mosaic.version = 11 : i64} {
  func.func @_bn_act_kernel(%arg0: i32, %arg1: memref<2x512xf32, #tpu.memory_space<vmem>>, %arg2: memref<1x512xf32, #tpu.memory_space<vmem>>, %arg3: memref<1x512xf32, #tpu.memory_space<vmem>>, %arg4: memref<2x512xf32, #tpu.memory_space<vmem>>) attributes {dimension_semantics = [#tpu.dimension_semantics<parallel>], iteration_bounds = array<i64: 1>, scalar_prefetch = 0 : i64, scratch_operands = 0 : i64, tpu.core_type = #tpu.core_type<tc>, window_params = [{transform_indices = @transform_0, window_bounds = array<i64: 2, 512>}, {pipeline_mode = #tpu.pipeline_mode<synchronous>, transform_indices = @transform_1, window_bounds = array<i64: 1, 512>}, {pipeline_mode = #tpu.pipeline_mode<synchronous>, transform_indices = @transform_2, window_bounds = array<i64: 1, 512>}, {transform_indices = @transform_3, window_bounds = array<i64: 2, 512>}]} {
    %c0 = arith.constant 0 : index
    %c0_0 = arith.constant 0 : index
    %0 = vector.load %arg1[%c0, %c0_0] : memref<2x512xf32, #tpu.memory_space<vmem>>, vector<2x512xf32>
    %c0_1 = arith.constant 0 : index
    %c0_2 = arith.constant 0 : index
    %1 = vector.load %arg2[%c0_1, %c0_2] : memref<1x512xf32, #tpu.memory_space<vmem>>, vector<1x512xf32>
    %2 = vector.broadcast %1 : vector<1x512xf32> to vector<2x512xf32>
    %3 = arith.mulf %0, %2 : vector<2x512xf32>
    %c0_3 = arith.constant 0 : index
    %c0_4 = arith.constant 0 : index
    %4 = vector.load %arg3[%c0_3, %c0_4] : memref<1x512xf32, #tpu.memory_space<vmem>>, vector<1x512xf32>
    %5 = vector.broadcast %4 : vector<1x512xf32> to vector<2x512xf32>
    %6 = arith.addf %3, %5 : vector<2x512xf32>
    %cst = arith.constant 0.000000e+00 : f32
    %7 = vector.broadcast %cst : f32 to vector<2x512xf32>
    %8 = arith.cmpf oge, %6, %7 : vector<2x512xf32>
    %cst_5 = arith.constant 0.00999999977 : f32
    %9 = vector.broadcast %cst_5 : f32 to vector<2x512xf32>
    %10 = arith.mulf %9, %6 : vector<2x512xf32>
    %11 = arith.select %8, %6, %10 : vector<2x512xi1>, vector<2x512xf32>
    %c0_6 = arith.constant 0 : index
    %c0_7 = arith.constant 0 : index
    %12 = vector.load %arg4[%c0_6, %c0_7] : memref<2x512xf32, #tpu.memory_space<vmem>>, vector<2x512xf32>
    tpu.vector_store %arg4[%c0_6, %c0_7], %11 {strides = array<i32>} : memref<2x512xf32, #tpu.memory_space<vmem>>, vector<2x512xf32>,
    return
  }
  func.func @transform_0(%arg0: i32) -> (i32, i32) {
    %c0_i32 = arith.constant 0 : i32
    %c0_i32_0 = arith.constant 0 : i32
    return %arg0, %c0_i32 : i32, i32
  }
  func.func @transform_1(%arg0: i32) -> (i32, i32) {
    %c0_i32 = arith.constant 0 : i32
    %c0_i32_0 = arith.constant 0 : i32
    %c0_i32_1 = arith.constant 0 : i32
    return %c0_i32, %c0_i32_0 : i32, i32
  }
  func.func @transform_2(%arg0: i32) -> (i32, i32) {
    %c0_i32 = arith.constant 0 : i32
    %c0_i32_0 = arith.constant 0 : i32
    %c0_i32_1 = arith.constant 0 : i32
    return %c0_i32, %c0_i32_0 : i32, i32
  }
  func.func @transform_3(%arg0: i32) -> (i32, i32) {
    %c0_i32 = arith.constant 0 : i32
    %c0_i32_0 = arith.constant 0 : i32
    return %arg0, %c0_i32 : i32, i32
  }
}

</mosaic_0001>

<bundles_post_ra>
// kernel: tile.13
= control target key start
LH: loop header
LB: loop body
LE: loop exit
PB: predicated region body
PF: predicated region fallthrough
CT: control target
= control target key end

     0   :  { %s64_s0 = inlined_call_operand.vmem [shape: f32[8], index: 0, kind: input, shape index: {}]   ;;  %s65_s1 = inlined_call_operand.vmem [shape: f32[64,8], index: 1, kind: output, shape index: {}]  }
   0x1   :  { %v4_v0 = vld [vmem:[%s64_s0] ss:$0 sm:$0xff] }
   0x2   :  { %5 = vst [vmem:[%s65_s1] sm:$0xff] %v4_v0  ;;  %20 = vst [vmem:[%s65_s1 + $0x8] sm:$0xff] %v4_v0 }
   0x3   :  { %21 = vst [vmem:[%s65_s1 + $0x10] sm:$0xff] %v4_v0  ;;  %22 = vst [vmem:[%s65_s1 + $0x18] sm:$0xff] %v4_v0 }
   0x4   :  { %23 = vst [vmem:[%s65_s1 + $0x20] sm:$0xff] %v4_v0  ;;  %24 = vst [vmem:[%s65_s1 + $0x28] sm:$0xff] %v4_v0 }
   0x5   :  { %25 = vst [vmem:[%s65_s1 + $0x30] sm:$0xff] %v4_v0  ;;  %26 = vst [vmem:[%s65_s1 + $0x38] sm:$0xff] %v4_v0 }

// kernel: tile.14
= control target key start
LH: loop header
LB: loop body
LE: loop exit
PB: predicated region body
PF: predicated region fallthrough
CT: control target
= control target key end

     0   :  { %vm6_vm0 = vcmask 1043458   ;;  %s11_s6 = smov 3  ;;  %s14_s7 = smov 12  ;;  %vm8_vm1 = vcmask 64512   ;;  %vm20_vm2 = vcmask 1048512   ;;  %vm32_vm3 = vcmask 982912   ;;  %s412_s0 = inlined_call_operand.vmem [shape: f32[64,8], index: 0, kind: input, shape index: {}]   ;;  %s413_s1 = inlined_call_operand.vmem [shape: f32[1,512], index: 1, kind: output, shape index: {}]  }
   0x1   :  { %v215_v0 = vld [vmem:[%s412_s0 + $0xf] ss:$16 sm:%s11_s6]   ;;  %s35_s12 = smov 3  ;;  %s38_s15 = smov 12  ;;  %vm44_vm4 = vcmask 917312   ;;  %vm56_vm5 = vcmask 851712  }
   0x2   :  { %v216_v1 = vld [vmem:[%s412_s0 + $0xf] ss:$16 sm:%s14_s7]   ;;  %v219_v3 = vld [vmem:[%s412_s0 + $0xd] ss:$16 sm:%s35_s12]   ;;  %s263_s16 = smov 120   ;;  %s23_s19 = smov 3 }
   0x3   :  { %v17_v2 = vsel %vm6_vm0, %v216_v1, %v215_v0  ;;  %v220_v4 = vld [vmem:[%s412_s0 + $0xd] ss:$16 sm:%s38_s15]   ;;  %s26_s20 = smov 12  ;;  %v217_v6 = vld [vmem:[%s412_s0 + $0xe] ss:$16 sm:%s23_s19]   ;;  %s47_s25 = smov 3 }
   0x4   :  { %18 = vrot.lane.b32.xlu0 %v17_v2, %s263_s16  ;;  %v41_v5 = vsel %vm6_vm0, %v220_v4, %v219_v3  ;;  %v218_v7 = vld [vmem:[%s412_s0 + $0xe] ss:$16 sm:%s26_s20]   ;;  %s264_s26 = smov 104   ;;  %s50_s29 = smov 12  ;;  %vm68_vm6 = vcmask 786112   ;;  %vm80_vm7 = vcmask 720512  }
   0x5   :  { %42 = vrot.lane.b32.xlu1 %v41_v5, %s264_s26  ;;  %v29_v8 = vsel %vm6_vm0, %v218_v7, %v217_v6  ;;  %v221_v9 = vld [vmem:[%s412_s0 + $0xc] ss:$16 sm:%s47_s25]   ;;  %s59_s3 = smov 3  ;;  %s62_s4 = smov 12  ;;  %vm92_vm8 = vcmask 654912   ;;  %vm104_vm9 = vcmask 589312  }
   0x6   :  { %v222_v10 = vld [vmem:[%s412_s0 + $0xc] ss:$16 sm:%s50_s29]   ;;  %s265_s5 = smov 112   ;;  %v223_v12 = vld [vmem:[%s412_s0 + $0xb] ss:$16 sm:%s59_s3]   ;;  %s71_s8 = smov 3 }
   0x7   :  { %v53_v11 = vsel %vm6_vm0, %v222_v10, %v221_v9  ;;  %v224_v13 = vld [vmem:[%s412_s0 + $0xb] ss:$16 sm:%s62_s4]   ;;  %v225_v14 = vld [vmem:[%s412_s0 + $0xa] ss:$16 sm:%s71_s8]   ;;  %s74_s13 = smov 12  ;;  %s266_s14 = smov 96  }
   0x8   :  { %30 = vrot.lane.b32.xlu0 %v29_v8, %s265_s5  ;;  %v65_v15 = vsel %vm6_vm0, %v224_v13, %v223_v12  ;;  %v226_v16 = vld [vmem:[%s412_s0 + $0xa] ss:$16 sm:%s74_s13]   ;;  %s83_s17 = smov 3  ;;  %s86_s18 = smov 12  ;;  %vm116_vm10 = vcmask 523712   ;;  %vm128_vm11 = vcmask 458112  }
   0x9   :  { %54 = vrot.lane.b32.xlu1 %v53_v11, %s266_s14  ;;  %v77_v17 = vsel %vm6_vm0, %v226_v16, %v225_v14  ;;  %v227_v18 = vld [vmem:[%s412_s0 + $0x9] ss:$16 sm:%s83_s17]   ;;  %s95_s23 = smov 3  ;;  %s267_s24 = smov 88   ;;  %vm140_vm12 = vcmask 392512   ;;  %vm152_vm13 = vcmask 326912  }
   0xa   :  { %v228_v19 = vld [vmem:[%s412_s0 + $0x9] ss:$16 sm:%s86_s18]   ;;  %v229_v20 = vld [vmem:[%s412_s0 + $0x8] ss:$16 sm:%s95_s23]   ;;  %s98_s27 = smov 12  ;;  %s107_s30 = smov 3 }
   0xb   :  { %v89_v21 = vsel %vm6_vm0, %v228_v19, %v227_v18  ;;  %v230_v22 = vld [vmem:[%s412_s0 + $0x8] ss:$16 sm:%s98_s27]   ;;  %s110_s2 = smov 12  ;;  %s268_s3 = smov 80   ;;  %v231_v23 = vld [vmem:[%s412_s0 + $0x7] ss:$16 sm:%s107_s30]  }
   0xc   :  { %66 = vrot.lane.b32.xlu0 %v65_v15, %s267_s24  ;;  %s119_s6 = smov 3  ;;  %v101_v24 = vsel %vm6_vm0, %v230_v22, %v229_v20  ;;  %v232_v25 = vld [vmem:[%s412_s0 + $0x7] ss:$16 sm:%s110_s2]   ;;  %s122_s11 = smov 12  ;;  %vm164_vm14 = vcmask 261312   ;;  %vm176_vm15 = vcmask 195712  }
   0xd   :  { %78 = vrot.lane.b32.xlu1 %v77_v17, %s268_s3  ;;  %v233_v26 = vld [vmem:[%s412_s0 + $0x6] ss:$16 sm:%s119_s6]   ;;  %s269_s12 = smov 72   ;;  %s131_s15 = smov 3  ;;  %v113_v28 = vsel %vm6_vm0, %v232_v25, %v231_v23 }
   0xe   :  { %v234_v27 = vld [vmem:[%s412_s0 + $0x6] ss:$16 sm:%s122_s11]   ;;  %s134_s16 = smov 12  ;;  %v235_v29 = vld [vmem:[%s412_s0 + $0x5] ss:$16 sm:%s131_s15]   ;;  %s143_s19 = smov 3 }
   0xf   :  { %s270_s20 = smov 64   ;;  %v236_v30 = vld [vmem:[%s412_s0 + $0x5] ss:$16 sm:%s134_s16]   ;;  %s146_s23 = smov 12  ;;  %v125_v31 = vsel %vm6_vm0, %v234_v27, %v233_v26  ;;  %v237_v32 = vld [vmem:[%s412_s0 + $0x4] ss:$16 sm:%s143_s19]  }
  0x10   :  { %90 = vrot.lane.b32.xlu0 %v89_v21, %s269_s12  ;;  %s155_s26 = smov 3  ;;  %s158_s27 = smov 12  ;;  %v238_v33 = vld [vmem:[%s412_s0 + $0x4] ss:$16 sm:%s146_s23]   ;;  %v137_v34 = vsel %vm6_vm0, %v236_v30, %v235_v29 }
  0x11   :  { %102 = vrot.lane.b32.xlu1 %v101_v24, %s270_s20  ;;  %s271_s28 = smov 56   ;;  %s167_s2 = smov 3  ;;  %v239_v35 = vld [vmem:[%s412_s0 + $0x3] ss:$16 sm:%s155_s26]   ;;  %v149_v37 = vsel %vm6_vm0, %v238_v33, %v237_v32 }
  0x12   :  { %s170_s5 = smov 12  ;;  %s272_s6 = smov 48   ;;  %v240_v36 = vld [vmem:[%s412_s0 + $0x3] ss:$16 sm:%s158_s27]   ;;  %v241_v38 = vld [vmem:[%s412_s0 + $0x2] ss:$16 sm:%s167_s2]  }
  0x13   :  { %s179_s9 = smov 3  ;;  %v242_v39 = vld [vmem:[%s412_s0 + $0x2] ss:$16 sm:%s170_s5]   ;;  %s182_s14 = smov 12  ;;  %v161_v41 = vsel %vm6_vm0, %v240_v36, %v239_v35 }
  0x14   :  { %114 = vrot.lane.b32.xlu0 %v113_v28, %s271_s28  ;;  %s2_s15 = smov 3  ;;  %s273_s16 = smov 40   ;;  %v243_v42 = vld [vmem:[%s412_s0 + $0x1] ss:$16 sm:%s179_s9]   ;;  %v173_v46 = vsel %vm6_vm0, %v242_v39, %v241_v38 }
  0x15   :  { %126 = vrot.lane.b32.xlu1 %v125_v31, %s272_s6  ;;  %v3_v40 = vld [vmem:[%s412_s0] ss:$16 sm:%s2_s15]   ;;  %s4_s19 = smov 12  ;;  %s274_s24 = smov 32  }
  0x16   :  { %v5_v43 = vld [vmem:[%s412_s0] ss:$16 sm:%s4_s19]   ;;  %v244_v44 = vld [vmem:[%s412_s0 + $0x1] ss:$16 sm:%s182_s14]   ;;  %s275_s0 = smov 24   ;;  %s276_s27 = smov 16  }
  0x17   :  { %v7_v45 = vsel %vm6_vm0, %v5_v43, %v3_v40  ;;  %v185_v47 = vsel %vm6_vm0, %v244_v44, %v243_v42  ;;  %s277_s28 = smov 8   ;;  %vm188_vm0 = vcmask 130112  }
  0x18   :  { %138 = vrot.lane.b32.xlu0 %v137_v34, %s273_s16  ;;  %9 = vst.msk [vmem:[#allocation0] ss:$8 sm:$0xf] %vm8_vm1, %v7_v45  }
  0x19   :  { %150 = vrot.lane.b32.xlu1 %v149_v37, %s274_s24 }
  0x1c   :  { %162 = vrot.lane.b32.xlu0 %v161_v41, %s275_s0 }
  0x1d   :  { %174 = vrot.lane.b32.xlu1 %v173_v46, %s276_s27 }
  0x20   :  { %186 = vrot.lane.b32.xlu0 %v185_v47, %s277_s28 }
  0x76   :  { %v19_v48 = vpop.permute.xlu0 %18  }
  0x77   :  { %21 = vst.msk [vmem:[#allocation0] ss:$8 sm:$0xf] %vm20_vm2, %v19_v48   ;;  %v43_v49 = vpop.permute.xlu1 %42  }
  0x7a   :  { %v31_v50 = vpop.permute.xlu0 %30  }
  0x7b   :  { %33 = vst.msk [vmem:[#allocation0] ss:$8 sm:$0xf] %vm32_vm3, %v31_v50   ;;  %v55_v51 = vpop.permute.xlu1 %54  }
  0x7c   :  { %45 = vst.msk [vmem:[#allocation0] ss:$8 sm:$0xf] %vm44_vm4, %v43_v49  }
  0x7d   :  { %57 = vst.msk [vmem:[#allocation0] ss:$8 sm:$0xf] %vm56_vm5, %v55_v51  }
  0x7e   :  { %v67_v52 = vpop.permute.xlu0 %66  }
  0x7f   :  { %69 = vst.msk [vmem:[#allocation0] ss:$8 sm:$0xf] %vm68_vm6, %v67_v52   ;;  %v79_v53 = vpop.permute.xlu1 %78  }
  0x80   :  { %81 = vst.msk [vmem:[#allocation0] ss:$8 sm:$0xf] %vm80_vm7, %v79_v53  }
  0x82   :  { %v91_v54 = vpop.permute.xlu0 %90  }
  0x83   :  { %93 = vst.msk [vmem:[#allocation0] ss:$8 sm:$0xf] %vm92_vm8, %v91_v54   ;;  %v103_v55 = vpop.permute.xlu1 %102  }
  0x84   :  { %105 = vst.msk [vmem:[#allocation0] ss:$8 sm:$0xf] %vm104_vm9, %v103_v55  }
  0x86   :  { %v115_v56 = vpop.permute.xlu0 %114  }
  0x87   :  { %117 = vst.msk [vmem:[#allocation0] ss:$8 sm:$0xf] %vm116_vm10, %v115_v56   ;;  %v127_v57 = vpop.permute.xlu1 %126  }
  0x88   :  { %129 = vst.msk [vmem:[#allocation0] ss:$8 sm:$0xf] %vm128_vm11, %v127_v57  }
  0x8a   :  { %v139_v58 = vpop.permute.xlu0 %138  }
  0x8b   :  { %141 = vst.msk [vmem:[#allocation0] ss:$8 sm:$0xf] %vm140_vm12, %v139_v58   ;;  %v151_v59 = vpop.permute.xlu1 %150  }
  0x8c   :  { %153 = vst.msk [vmem:[#allocation0] ss:$8 sm:$0xf] %vm152_vm13, %v151_v59  }
  0x8e   :  { %v163_v60 = vpop.permute.xlu0 %162  }
  0x8f   :  { %165 = vst.msk [vmem:[#allocation0] ss:$8 sm:$0xf] %vm164_vm14, %v163_v60   ;;  %v175_v61 = vpop.permute.xlu1 %174  }
  0x90   :  { %177 = vst.msk [vmem:[#allocation0] ss:$8 sm:$0xf] %vm176_vm15, %v175_v61  }
  0x92   :  { %v187_v62 = vpop.permute.xlu0 %186  }
  0x93   :  { %189 = vst.msk [vmem:[#allocation0] ss:$8 sm:$0xf] %vm188_vm0, %v187_v62  }
  0x9a   :  { %v193_v63 = vld [vmem:[#allocation0] sm:$0x1]  ;;  %v197_v0 = vld [vmem:[#allocation0 + $0x8] sm:$0x1]  ;;  %v202_v1 = vld [vmem:[#allocation0 + $0x10] sm:$0x1] }
  0x9b   :  { %195 = vst [vmem:[%s413_s1] sm:$0x1] %v193_v63  ;;  %245 = vst [vmem:[%s413_s1 + $0x1] sm:$0x1] %v197_v0  ;;  %v208_v2 = vld [vmem:[#allocation0 + $0x18] sm:$0x1] }
  0x9c   :  { %246 = vst [vmem:[%s413_s1 + $0x2] sm:$0x1] %v202_v1  ;;  %247 = vst [vmem:[%s413_s1 + $0x3] sm:$0x1] %v208_v2 }

// kernel: down_sample.3
= control target key start
LH: loop header
LB: loop body
LE: loop exit
PB: predicated region body
PF: predicated region fallthrough
CT: control target
= control target key end

     0   :  { %v17_v0 = vlaneseq  ;;  %v98_v1 = vmov 1983009808   ;;  %s131_s1 = inlined_call_operand.vmem [shape: f32[1,512], index: 1, kind: input, shape index: {}]   ;;  %s132_s2 = inlined_call_operand.vmem [shape: f32[1,512], index: 2, kind: input, shape index: {}]   ;;  %s133_s0 = inlined_call_operand.vmem [shape: f32[2,512], index: 0, kind: input, shape index: {}]   ;;  %s134_s3 = inlined_call_operand.vmem [shape: f32[2,512], index: 3, kind: output, shape index: {}]  }
   0x1   :  { %v36_v2 = vunpack.c.l.s4 %v98_v1  ;;  %v15_v4 = vld [vmem:[%s131_s1] sm:$0xf] }
   0x2   :  { %v18_v3 = vshrl.u32 %v17_v0, 7  ;;  %v52_v10 = vld [vmem:[%s132_s2] sm:$0xf] }
   0x3   :  { %v37_v5 = vunpack.c.0.s8 %v36_v2  ;;  %v14_v26 = vld [vmem:[%s133_s0] sm:$0xff] }
   0x4   :  { %v19_v6 = vsub.s32 0, %v18_v3  ;;  %v23_v7 = vsub.s32 1, %v18_v3  ;;  %v27_v8 = vsub.s32 2, %v18_v3  ;;  %v31_v9 = vsub.s32 3, %v18_v3 }
   0x5   :  { %v40_v11 = vsub.s32 %v37_v5, %v18_v3 }
   0x6   :  { %v20_v12 = vrot.slane %v15_v4, %v19_v6  ;;  %v24_v13 = vrot.slane %v15_v4, %v23_v7  ;;  %v28_v14 = vrot.slane %v15_v4, %v27_v8  ;;  %v32_v15 = vrot.slane %v15_v4, %v31_v9 }
   0x7   :  { %v57_v16 = vrot.slane %v52_v10, %v19_v6  ;;  %v61_v17 = vrot.slane %v52_v10, %v23_v7  ;;  %v65_v18 = vrot.slane %v52_v10, %v27_v8  ;;  %v69_v19 = vrot.slane %v52_v10, %v31_v9 }
   0x8   :  { %v33_v20 = vcombine.low %v20_v12, %v24_v13  ;;  %v34_v21 = vcombine.low %v28_v14, %v32_v15 }
   0x9   :  { %v70_v22 = vcombine.low %v57_v16, %v61_v17  ;;  %v71_v23 = vcombine.low %v65_v18, %v69_v19 }
   0xa   :  { %v41_v24 = vrot.slane %v33_v20, %v40_v11  ;;  %v48_v25 = vrot.slane %v34_v21, %v40_v11 }
   0xb   :  { %v78_v27 = vrot.slane %v70_v22, %v40_v11  ;;  %v85_v28 = vrot.slane %v71_v23, %v40_v11 }
   0xc   :  { %v49_v29 = vcombine.low %v41_v24, %v48_v25 }
   0xd   :  { %v86_v30 = vcombine.low %v78_v27, %v85_v28 }
   0xe   :  { %v51_v31 = vmul.f32 %v49_v29, %v14_v26 }
  0x10   :  { %v88_v32 = vadd.f32 %v86_v30, %v51_v31 }
  0x12   :  { %vm89_vm0 = vcmp.ge.f32.partialorder %v88_v32, 0.0  ;;  %v90_v33 = vmul.f32 0.01, %v88_v32 }
  0x14   :  { %v91_v34 = vsel %vm89_vm0, %v88_v32, %v90_v33 }
  0x15   :  { %92 = vst [vmem:[%s134_s3] sm:$0xff] %v91_v34 }

// kernel: down_sample.2
= control target key start
LH: loop header
LB: loop body
LE: loop exit
PB: predicated region body
PF: predicated region fallthrough
CT: control target
= control target key end

     0   :  { %vm170_vm0 = vcmask 64512   ;;  %vm173_vm1 = vcmask 58368   ;;  %s1315_s19 = smov 8   ;;  %s1316_s20 = smov 16   ;;  %vm410_vm2 = vcmask 130112   ;;  %vm515_vm3 = vcmask 195712   ;;  %s1731_s0 = inlined_call_operand.vmem [shape: bf16[2,9,18,8], index: 0, kind: input, shape index: {}]   ;;  %s1732_s1 = inlined_call_operand.vmem [shape: bf16[48,128], index: 1, kind: input, shape index: {}]   ;;  %s1733_s3 = inlined_call_operand.vmem [shape: f32[1,1,128], index: 3, kind: output, shape index: {1}]   ;;  %s1734_s4 = inlined_call_operand.vmem [shape: f32[1,1,128], index: 4, kind: output, shape index: {2}]   ;;  %s1735_s2 = inlined_call_operand.vmem [shape: f32[2,64,8], index: 2, kind: output, shape index: {0}]  }
   0x1   :  { %v1224_v0 = vld [vmem:[%s1731_s0] sm:$0xff]   ;;  %v65_v1 = vld [vmem:[%s1731_s0 + $0xc] sm:$0xff]   ;;  %v64_v2 = vld [vmem:[%s1731_s0 + $0x8] sm:$0x1]  ;;  %s1317_s21 = smov 24   ;;  %s1318_s22 = smov 32  }
   0x2   :  { %v1225_v3 = vunpack.c.l.bf16 %v1224_v0  ;;  %v1226_v4 = vunpack.c.h.bf16 %v1224_v0  ;;  %v119_v5 = vunpack.c.l.bf16 %v65_v1  ;;  %v120_v6 = vunpack.c.h.bf16 %v65_v1  ;;  %v67_v7 = vld [vmem:[%s1731_s0 + $0x14] sm:$0x1]  ;;  %v1259_v10 = vld [vmem:[%s1731_s0 + $0x18] sm:$0xff]   ;;  %v71_v11 = vld [vmem:[%s1731_s0 + $0x24] sm:$0xff]   ;;  %s1319_s7 = smov 40  }
   0x3   :  { %v118_v8 = vunpack.c.l.bf16 %v64_v2  ;;  %v121_v9 = vunpack.c.l.bf16 %v67_v7  ;;  %v70_v12 = vld [vmem:[%s1731_s0 + $0x20] sm:$0x1]  ;;  %v1229_v13 = vunpack.c.l.bf16 %v1259_v10  ;;  %v1230_v14 = vunpack.c.h.bf16 %v1259_v10  ;;  %v73_v17 = vld [vmem:[%s1731_s0 + $0x2c] sm:$0x1]  ;;  %v1260_v18 = vld [vmem:[%s1731_s0 + $0x30] sm:$0xff]  }
   0x4   :  { %171 = vst.msk [vmem:[#allocation2] sm:$0xff] %vm170_vm0, %v1225_v3  ;;  %172 = vst.msk [vmem:[#allocation2 + $0x8] sm:$0xff] %vm170_vm0, %v1226_v4  ;;  %v125_v15 = vunpack.c.l.bf16 %v71_v11  ;;  %v126_v16 = vunpack.c.h.bf16 %v71_v11  ;;  %v77_v19 = vld [vmem:[%s1731_s0 + $0x3c] sm:$0xff]   ;;  %v124_v20 = vunpack.c.l.bf16 %v70_v12  ;;  %v127_v21 = vunpack.c.l.bf16 %v73_v17  ;;  %v1261_v24 = vld [vmem:[%s1731_s0 + $0x48] sm:$0xff]  }
   0x5   :  { %175 = vst.msk [vmem:[#allocation2 + $0x18] sm:$0xff] %vm170_vm0, %v119_v5  ;;  %176 = vst.msk [vmem:[#allocation2 + $0x20] sm:$0xff] %vm170_vm0, %v120_v6  ;;  %v1233_v22 = vunpack.c.l.bf16 %v1260_v18  ;;  %v1234_v23 = vunpack.c.h.bf16 %v1260_v18  ;;  %v83_v25 = vld [vmem:[%s1731_s0 + $0x54] sm:$0xff]   ;;  %v131_v27 = vunpack.c.l.bf16 %v77_v19  ;;  %v132_v28 = vunpack.c.h.bf16 %v77_v19  ;;  %v79_v31 = vld [vmem:[%s1731_s0 + $0x44] sm:$0x1] }
   0x6   :  { %174 = vst.msk [vmem:[#allocation2 + $0x10] sm:$0x3] %vm173_vm1, %v118_v8  ;;  %177 = vst.msk [vmem:[#allocation2 + $0x28] sm:$0x3] %vm173_vm1, %v121_v9  ;;  %v76_v26 = vld [vmem:[%s1731_s0 + $0x38] sm:$0x1]  ;;  %v1237_v29 = vunpack.c.l.bf16 %v1261_v24  ;;  %v1238_v30 = vunpack.c.h.bf16 %v1261_v24  ;;  %v137_v34 = vunpack.c.l.bf16 %v83_v25  ;;  %v138_v35 = vunpack.c.h.bf16 %v83_v25 }
   0x7   :  { %178 = vst.msk [vmem:[#allocation2 + $0x30] sm:$0xff] %vm170_vm0, %v1229_v13  ;;  %179 = vst.msk [vmem:[#allocation2 + $0x38] sm:$0xff] %vm170_vm0, %v1230_v14  ;;  %v82_v32 = vld [vmem:[%s1731_s0 + $0x50] sm:$0x1]  ;;  %v85_v33 = vld [vmem:[%s1731_s0 + $0x5c] sm:$0x1]  ;;  %v130_v36 = vunpack.c.l.bf16 %v76_v26  ;;  %v133_v37 = vunpack.c.l.bf16 %v79_v31 }
   0x8   :  { %181 = vst.msk [vmem:[#allocation2 + $0x48] sm:$0xff] %vm170_vm0, %v125_v15  ;;  %182 = vst.msk [vmem:[#allocation2 + $0x50] sm:$0xff] %vm170_vm0, %v126_v16  ;;  %v1262_v38 = vld [vmem:[%s1731_s0 + $0x60] sm:$0xff]   ;;  %v89_v39 = vld [vmem:[%s1731_s0 + $0x6c] sm:$0xff]   ;;  %v136_v41 = vunpack.c.l.bf16 %v82_v32  ;;  %v139_v42 = vunpack.c.l.bf16 %v85_v33  ;;  %vm620_vm4 = vcmask 261312   ;;  %vm726_vm5 = vcmask 326912  }
   0x9   :  { %180 = vst.msk [vmem:[#allocation2 + $0x40] sm:$0x3] %vm173_vm1, %v124_v20  ;;  %183 = vst.msk [vmem:[#allocation2 + $0x58] sm:$0x3] %vm173_vm1, %v127_v21  ;;  %v1263_v40 = vld [vmem:[%s1731_s0 + $0x78] sm:$0xff]   ;;  %v1241_v43 = vunpack.c.l.bf16 %v1262_v38  ;;  %v1242_v44 = vunpack.c.h.bf16 %v1262_v38  ;;  %v95_v45 = vld [vmem:[%s1731_s0 + $0x84] sm:$0xff]   ;;  %v143_v50 = vunpack.c.l.bf16 %v89_v39  ;;  %v144_v51 = vunpack.c.h.bf16 %v89_v39 }
   0xa   :  { %184 = vst.msk [vmem:[#allocation2 + $0x60] sm:$0xff] %vm170_vm0, %v1233_v22  ;;  %185 = vst.msk [vmem:[#allocation2 + $0x68] sm:$0xff] %vm170_vm0, %v1234_v23  ;;  %v1264_v46 = vld [vmem:[%s1731_s0 + $0x90] sm:$0xff]   ;;  %v1245_v48 = vunpack.c.l.bf16 %v1263_v40  ;;  %v1246_v49 = vunpack.c.h.bf16 %v1263_v40  ;;  %v94_v52 = vld [vmem:[%s1731_s0 + $0x80] sm:$0x1]  ;;  %v149_v57 = vunpack.c.l.bf16 %v95_v45  ;;  %v150_v58 = vunpack.c.h.bf16 %v95_v45 }
   0xb   :  { %187 = vst.msk [vmem:[#allocation2 + $0x78] sm:$0xff] %vm170_vm0, %v131_v27  ;;  %188 = vst.msk [vmem:[#allocation2 + $0x80] sm:$0xff] %vm170_vm0, %v132_v28  ;;  %v91_v47 = vld [vmem:[%s1731_s0 + $0x74] sm:$0x1]  ;;  %v97_v53 = vld [vmem:[%s1731_s0 + $0x8c] sm:$0x1]  ;;  %v1249_v55 = vunpack.c.l.bf16 %v1264_v46  ;;  %v1250_v56 = vunpack.c.h.bf16 %v1264_v46  ;;  %v148_v1 = vunpack.c.l.bf16 %v94_v52 }
   0xc   :  { %190 = vst.msk [vmem:[#allocation2 + $0x90] sm:$0xff] %vm170_vm0, %v1237_v29  ;;  %191 = vst.msk [vmem:[#allocation2 + $0x98] sm:$0xff] %vm170_vm0, %v1238_v30  ;;  %v100_v54 = vld [vmem:[%s1731_s0 + $0x98] sm:$0x1]  ;;  %v101_v59 = vld [vmem:[%s1731_s0 + $0x9c] sm:$0xff]   ;;  %v145_v0 = vunpack.c.l.bf16 %v91_v47  ;;  %v151_v2 = vunpack.c.l.bf16 %v97_v53  ;;  %vm831_vm6 = vcmask 392512  }
   0xd   :  { %193 = vst.msk [vmem:[#allocation2 + $0xa8] sm:$0xff] %vm170_vm0, %v137_v34  ;;  %194 = vst.msk [vmem:[#allocation2 + $0xb0] sm:$0xff] %vm170_vm0, %v138_v35  ;;  %v1265_v60 = vld [vmem:[%s1731_s0 + $0xa8] sm:$0xff]   ;;  %v107_v61 = vld [vmem:[%s1731_s0 + $0xb4] sm:$0xff]   ;;  %v154_v3 = vunpack.c.l.bf16 %v100_v54  ;;  %v155_v7 = vunpack.c.l.bf16 %v101_v59  ;;  %v156_v8 = vunpack.c.h.bf16 %v101_v59  ;;  %vm872_vm7 = vcmask 392192  }
   0xe   :  { %186 = vst.msk [vmem:[#allocation2 + $0x70] sm:$0x3] %vm173_vm1, %v130_v36  ;;  %189 = vst.msk [vmem:[#allocation2 + $0x88] sm:$0x3] %vm173_vm1, %v133_v37  ;;  %v314_v62 = vld [vmem:[#allocation2 + $0x1] sm:$0xff]  ;;  %v1456_v63 = vld [vmem:[#allocation2 + $0x19] sm:$0xff]  ;;  %v1253_v9 = vunpack.c.l.bf16 %v1265_v60  ;;  %v1254_v13 = vunpack.c.h.bf16 %v1265_v60  ;;  %v161_v14 = vunpack.c.l.bf16 %v107_v61  ;;  %v162_v15 = vunpack.c.h.bf16 %v107_v61 }
   0xf   :  { %192 = vst.msk [vmem:[#allocation2 + $0xa0] sm:$0x3] %vm173_vm1, %v136_v41  ;;  %195 = vst.msk [vmem:[#allocation2 + $0xb8] sm:$0x3] %vm173_vm1, %v139_v42  ;;  %v1183_v4 = vpack.c.bf16 %v1456_v63, %v314_v62  ;;  %v419_v5 = vld [vmem:[#allocation2 + $0x9] sm:$0xff]  ;;  %v420_v6 = vld [vmem:[#allocation2 + $0x21] sm:$0xff] }
  0x10   :  { %196 = vst.msk [vmem:[#allocation2 + $0xc0] sm:$0xff] %vm170_vm0, %v1241_v43  ;;  %197 = vst.msk [vmem:[#allocation2 + $0xc8] sm:$0xff] %vm170_vm0, %v1242_v44  ;;  %v1191_v10 = vpack.c.bf16 %v420_v6, %v419_v5  ;;  %v1467_v11 = vld [vmem:[#allocation2 + $0x31] sm:$0xff]  ;;  %v1469_v12 = vld [vmem:[#allocation2 + $0x49] sm:$0xff] }
  0x11   :  { %199 = vst.msk [vmem:[#allocation2 + $0xd8] sm:$0xff] %vm170_vm0, %v143_v50  ;;  %200 = vst.msk [vmem:[#allocation2 + $0xe0] sm:$0xff] %vm170_vm0, %v144_v51  ;;  %386 = vrot.lane.b32.xlu0 %v1183_v4, %s1315_s19  ;;  %v1184_v16 = vpack.c.bf16 %v1469_v12, %v1467_v11  ;;  %v421_v17 = vld [vmem:[#allocation2 + $0x39] sm:$0xff]  ;;  %v422_v18 = vld [vmem:[#allocation2 + $0x51] sm:$0xff]  ;;  %v1215_v39 = vpack.c.bf16 %v1467_v11, %v1456_v63 }
  0x12   :  { %202 = vst.msk [vmem:[#allocation2 + $0xf0] sm:$0xff] %vm170_vm0, %v1245_v48  ;;  %203 = vst.msk [vmem:[#allocation2 + $0xf8] sm:$0xff] %vm170_vm0, %v1246_v49  ;;  %v524_v19 = vld [vmem:[#allocation2 + $0xa] sm:$0xff]  ;;  %491 = vrot.lane.b32.xlu1 %v1191_v10, %s1316_s20  ;;  %v1192_v20 = vpack.c.bf16 %v422_v18, %v421_v17  ;;  %v525_v21 = vld [vmem:[#allocation2 + $0x22] sm:$0xff] }
  0x13   :  { %205 = vst.msk [vmem:[#allocation2 + $0x108] sm:$0xff] %vm170_vm0, %v149_v57  ;;  %206 = vst.msk [vmem:[#allocation2 + $0x110] sm:$0xff] %vm170_vm0, %v150_v58  ;;  %v631_v22 = vld [vmem:[#allocation2 + $0x30] sm:$0xff]  ;;  %v632_v23 = vld [vmem:[#allocation2 + $0x48] sm:$0xff]  ;;  %v1199_v27 = vpack.c.bf16 %v525_v21, %v524_v19 }
  0x14   :  { %208 = vst.msk [vmem:[#allocation2 + $0x120] sm:$0xff] %vm170_vm0, %v1249_v55  ;;  %209 = vst.msk [vmem:[#allocation2 + $0x128] sm:$0xff] %vm170_vm0, %v1250_v56  ;;  %v526_v24 = vld [vmem:[#allocation2 + $0x3a] sm:$0xff]  ;;  %v527_v25 = vld [vmem:[#allocation2 + $0x52] sm:$0xff]  ;;  %v1176_v26 = vpack.c.bf16 %v632_v23, %v631_v22 }
  0x15   :  { %201 = vst.msk [vmem:[#allocation2 + $0xe8] sm:$0x3] %vm173_vm1, %v145_v0  ;;  %204 = vst.msk [vmem:[#allocation2 + $0x100] sm:$0x3] %vm173_vm1, %v148_v1  ;;  %388 = vrot.lane.b32.xlu0 %v1184_v16, %s1315_s19  ;;  %v1200_v28 = vpack.c.bf16 %v527_v25, %v526_v24  ;;  %v630_v29 = vld [vmem:[#allocation2 + $0x18] sm:$0xff]  ;;  %v633_v30 = vld [vmem:[#allocation2 + $0x60] sm:$0xff] }
  0x16   :  { %207 = vst.msk [vmem:[#allocation2 + $0x118] sm:$0x3] %vm173_vm1, %v151_v2  ;;  %210 = vst.msk [vmem:[#allocation2 + $0x130] sm:$0x3] %vm173_vm1, %v154_v3  ;;  %493 = vrot.lane.b32.xlu1 %v1192_v20, %s1316_s20  ;;  %v1488_v31 = vld [vmem:[#allocation2 + $0x78] sm:$0xff]  ;;  %v1490_v32 = vld [vmem:[#allocation2 + $0x90] sm:$0xff]  ;;  %v1207_v35 = vpack.c.bf16 %v631_v22, %v630_v29  ;;  %v1208_v37 = vpack.c.bf16 %v633_v30, %v632_v23 }
  0x17   :  { %211 = vst.msk [vmem:[#allocation2 + $0x138] sm:$0xff] %vm170_vm0, %v155_v7  ;;  %212 = vst.msk [vmem:[#allocation2 + $0x140] sm:$0xff] %vm170_vm0, %v156_v8  ;;  %v1492_v33 = vld [vmem:[#allocation2 + $0xa8] sm:$0xff]  ;;  %v1177_v34 = vpack.c.bf16 %v1488_v31, %v633_v30  ;;  %v1506_v41 = vld [vmem:[#allocation2 + $0x79] sm:$0xff]  ;;  %v1209_v20 = vpack.c.bf16 %v1490_v32, %v1488_v31 }
  0x18   :  { %214 = vst.msk [vmem:[#allocation2 + $0x150] sm:$0xff] %vm170_vm0, %v1253_v9  ;;  %215 = vst.msk [vmem:[#allocation2 + $0x158] sm:$0xff] %vm170_vm0, %v1254_v13  ;;  %v1178_v36 = vpack.c.bf16 %v1492_v33, %v1490_v32  ;;  %v738_v38 = vld [vmem:[#allocation2 + $0x61] sm:$0xff]  ;;  %v1508_v42 = vld [vmem:[#allocation2 + $0x91] sm:$0xff] }
  0x19   :  { %217 = vst.msk [vmem:[#allocation2 + $0x168] sm:$0xff] %vm170_vm0, %v161_v14  ;;  %218 = vst.msk [vmem:[#allocation2 + $0x170] sm:$0xff] %vm170_vm0, %v162_v15  ;;  %596 = vrot.lane.b32.xlu0 %v1199_v27, %s1317_s21  ;;  %v1216_v40 = vpack.c.bf16 %v738_v38, %v1469_v12  ;;  %v1510_v43 = vld [vmem:[#allocation2 + $0xa9] sm:$0xff]  ;;  %v1266_v44 = vld [vmem:[%s1731_s0 + $0xc0] sm:$0xff]   ;;  %v1185_v54 = vpack.c.bf16 %v1506_v41, %v738_v38  ;;  %v1217_v23 = vpack.c.bf16 %v1508_v42, %v1506_v41 }
  0x1a   :  { %307 = vst.msk [vmem:[#allocation3 + $0x8] sm:$0xff] %vm170_vm0, %v1176_v26  ;;  %598 = vrot.lane.b32.xlu1 %v1200_v28, %s1317_s21  ;;  %308 = vst.msk [vmem:[#allocation3 + $0x10] sm:$0xff] %vm170_vm0, %v1177_v34  ;;  %v103_v45 = vld [vmem:[%s1731_s0 + $0xa4] sm:$0x1]  ;;  %v423_v46 = vld [vmem:[#allocation2 + $0x69] sm:$0xff]  ;;  %v1257_v48 = vunpack.c.l.bf16 %v1266_v44  ;;  %v1258_v49 = vunpack.c.h.bf16 %v1266_v44  ;;  %v1186_v61 = vpack.c.bf16 %v1510_v43, %v1508_v42 }
  0x1b   :  { %309 = vst.msk [vmem:[#allocation3 + $0x18] sm:$0xff] %vm170_vm0, %v1178_v36  ;;  %v424_v47 = vld [vmem:[#allocation2 + $0x81] sm:$0xff]  ;;  %v106_v50 = vld [vmem:[%s1731_s0 + $0xb0] sm:$0x1]  ;;  %v157_v51 = vunpack.c.l.bf16 %v103_v45  ;;  %v109_v52 = vld [vmem:[%s1731_s0 + $0xbc] sm:$0x1] }
  0x1c   :  { %v112_v53 = vld [vmem:[%s1731_s0 + $0xc8] sm:$0x1]  ;;  %v425_v55 = vld [vmem:[#allocation2 + $0x99] sm:$0xff]  ;;  %v426_v56 = vld [vmem:[#allocation2 + $0xb1] sm:$0xff]  ;;  %v160_v57 = vunpack.c.l.bf16 %v106_v50  ;;  %v163_v58 = vunpack.c.l.bf16 %v109_v52  ;;  %220 = vst.msk [vmem:[#allocation2 + $0x180] sm:$0xff] %vm170_vm0, %v1257_v48  ;;  %v1193_v4 = vpack.c.bf16 %v424_v47, %v423_v46 }
  0x1d   :  { %702 = vrot.lane.b32.xlu0 %v1207_v35, %s1318_s22  ;;  %v166_v59 = vunpack.c.l.bf16 %v112_v53  ;;  %v113_v60 = vld [vmem:[%s1731_s0 + $0xcc] sm:$0xff]   ;;  %221 = vst.msk [vmem:[#allocation2 + $0x188] sm:$0xff] %vm170_vm0, %v1258_v49  ;;  %v226_v0 = vld [vmem:[#allocation2] sm:$0xff]  ;;  %v1194_v5 = vpack.c.bf16 %v426_v56, %v425_v55  ;;  %v234_v12 = vld [vmem:[#allocation2 + $0xd8] sm:$0xff] }
  0x1e   :  { %704 = vrot.lane.b32.xlu1 %v1208_v37, %s1318_s22  ;;  %213 = vst.msk [vmem:[#allocation2 + $0x148] sm:$0x3] %vm173_vm1, %v157_v51  ;;  %v167_v62 = vunpack.c.l.bf16 %v113_v60  ;;  %v168_v63 = vunpack.c.h.bf16 %v113_v60  ;;  %216 = vst.msk [vmem:[#allocation2 + $0x160] sm:$0x3] %vm173_vm1, %v160_v57  ;;  %v1175_v1 = vpack.c.bf16 %v630_v29, %v226_v0  ;;  %v1312_v2 = vld [vmem:[%s1732_s1] sm:$0xff]   ;;  %v1313_v3 = vld [vmem:[%s1732_s1 + $0x8] sm:$0xff]  }
  0x1f   :  { %219 = vst.msk [vmem:[#allocation2 + $0x178] sm:$0x3] %vm173_vm1, %v163_v58  ;;  %222 = vst.msk [vmem:[#allocation2 + $0x190] sm:$0x3] %vm173_vm1, %v166_v59  ;;  %1278 = vmatprep.subr.bf16.mxu0 %v1312_v2  ;;  %v528_v6 = vld [vmem:[#allocation2 + $0x6a] sm:$0xff]  ;;  %v529_v7 = vld [vmem:[#allocation2 + $0x82] sm:$0xff]  ;;  %1300 = vmatprep.subr.bf16.mxu1 %v1312_v2 }
  0x20   :  { %223 = vst.msk [vmem:[#allocation2 + $0x198] sm:$0xff] %vm170_vm0, %v167_v62  ;;  %224 = vst.msk [vmem:[#allocation2 + $0x1a0] sm:$0xff] %vm170_vm0, %v168_v63  ;;  %1279 = vmatpush3.bf16.msra.mxu0 %v1312_v2  ;;  %v530_v8 = vld [vmem:[#allocation2 + $0x9a] sm:$0xff]  ;;  %v531_v9 = vld [vmem:[#allocation2 + $0xb2] sm:$0xff]  ;;  %1303 = vmatpush3.bf16.msra.mxu1 %v1312_v2  ;;  %v1201_v13 = vpack.c.bf16 %v529_v7, %v528_v6 }
  0x21   :  { %807 = vrot.lane.b32.xlu0 %v1215_v39, %s1319_s7  ;;  %306 = vst.msk [vmem:[#allocation3] sm:$0xff] %vm170_vm0, %v1175_v1  ;;  %1280 = vmatprep.subr.bf16.mxu0 %v1313_v3  ;;  %v1314_v10 = vld [vmem:[%s1732_s1 + $0x10] sm:$0xff]   ;;  %v639_v14 = vld [vmem:[#allocation2 + $0x108] sm:$0xff]  ;;  %v1558_v15 = vld [vmem:[#allocation2 + $0x120] sm:$0xff]  ;;  %v1202_v17 = vpack.c.bf16 %v531_v9, %v530_v8 }
  0x22   :  { %809 = vrot.lane.b32.xlu1 %v1216_v40, %s1319_s7  ;;  %v1555_v11 = vld [vmem:[#allocation2 + $0xf0] sm:$0xff]  ;;  %1301 = vmatprep.subr.bf16.mxu1 %v1313_v3  ;;  %v1180_v18 = vpack.c.bf16 %v1558_v15, %v639_v14  ;;  %v637_v19 = vld [vmem:[#allocation2 + $0xc0] sm:$0xff]  ;;  %v641_v41 = vld [vmem:[#allocation2 + $0x138] sm:$0xff] }
  0x23   :  { %v1179_v16 = vpack.c.bf16 %v1555_v11, %v234_v12  ;;  %v1210_v21 = vpack.c.bf16 %v637_v19, %v1492_v33  ;;  %v742_v22 = vld [vmem:[#allocation2 + $0xc1] sm:$0xff]  ;;  %v322_v25 = vld [vmem:[#allocation2 + $0xd9] sm:$0xff]  ;;  %v323_v26 = vld [vmem:[#allocation2 + $0xf1] sm:$0xff]  ;;  %v1211_v49 = vpack.c.bf16 %v639_v14, %v1555_v11  ;;  %v1212_v50 = vpack.c.bf16 %v641_v41, %v1558_v15 }
  0x24   :  { %1281 = vmatpush3.bf16.msra.mxu0 %v1313_v3  ;;  %311 = vst.msk [vmem:[#allocation3 + $0x28] sm:$0xff] %vm170_vm0, %v1180_v18  ;;  %1304 = vmatpush3.bf16.msra.mxu1 %v1313_v3  ;;  %v1218_v24 = vpack.c.bf16 %v742_v22, %v1510_v43  ;;  %v324_v27 = vld [vmem:[#allocation2 + $0x109] sm:$0xff]  ;;  %v325_v28 = vld [vmem:[#allocation2 + $0x121] sm:$0xff]  ;;  %v1187_v29 = vpack.c.bf16 %v323_v26, %v322_v25  ;;  %v428_v32 = vld [vmem:[#allocation2 + $0xf9] sm:$0xff] }
  0x25   :  { %390 = vrot.lane.b32.xlu0 %v1185_v54, %s1315_s19  ;;  %1282 = vmatprep.subr.bf16.mxu0 %v1314_v10  ;;  %310 = vst.msk [vmem:[#allocation3 + $0x20] sm:$0xff] %vm170_vm0, %v1179_v16  ;;  %v1188_v30 = vpack.c.bf16 %v325_v28, %v324_v27  ;;  %v427_v31 = vld [vmem:[#allocation2 + $0xe1] sm:$0xff]  ;;  %v429_v33 = vld [vmem:[#allocation2 + $0x111] sm:$0xff]  ;;  %v430_v34 = vld [vmem:[#allocation2 + $0x129] sm:$0xff]  ;;  %v1219_v52 = vpack.c.bf16 %v324_v27, %v323_v26 }
  0x26   :  { %392 = vrot.lane.b32.xlu1 %v1186_v61, %s1315_s19  ;;  %1302 = vmatprep.subr.bf16.mxu1 %v1314_v10  ;;  %v1195_v35 = vpack.c.bf16 %v428_v32, %v427_v31  ;;  %v1196_v36 = vpack.c.bf16 %v430_v34, %v429_v33  ;;  %v532_v37 = vld [vmem:[#allocation2 + $0xe2] sm:$0xff]  ;;  %v533_v38 = vld [vmem:[#allocation2 + $0xfa] sm:$0xff]  ;;  %v534_v39 = vld [vmem:[#allocation2 + $0x112] sm:$0xff] }
  0x27   :  { %v535_v40 = vld [vmem:[#allocation2 + $0x12a] sm:$0xff]  ;;  %v1203_v43 = vpack.c.bf16 %v533_v38, %v532_v37  ;;  %v644_v45 = vld [vmem:[#allocation2 + $0x180] sm:$0xff]  ;;  %v538_v3 = vld [vmem:[#allocation2 + $0x172] sm:$0xff] }
  0x28   :  { %1283 = vmatpush3.bf16.msra.mxu0 %v1314_v10  ;;  %1305 = vmatpush3.bf16.msra.mxu1 %v1314_v10  ;;  %v642_v42 = vld [vmem:[#allocation2 + $0x150] sm:$0xff]  ;;  %v643_v44 = vld [vmem:[#allocation2 + $0x168] sm:$0xff]  ;;  %v1204_v47 = vpack.c.bf16 %v535_v40, %v534_v39  ;;  %v746_v51 = vld [vmem:[#allocation2 + $0x139] sm:$0xff] }
  0x29   :  { %495 = vrot.lane.b32.xlu0 %v1193_v4, %s1316_s20  ;;  %v1181_v46 = vpack.c.bf16 %v642_v42, %v641_v41  ;;  %v1182_v48 = vpack.c.bf16 %v644_v45, %v643_v44  ;;  %v1220_v53 = vpack.c.bf16 %v746_v51, %v325_v28  ;;  %v327_v54 = vld [vmem:[#allocation2 + $0x151] sm:$0xff]  ;;  %v328_v55 = vld [vmem:[#allocation2 + $0x169] sm:$0xff]  ;;  %v329_v56 = vld [vmem:[#allocation2 + $0x181] sm:$0xff]  ;;  %v1213_v8 = vpack.c.bf16 %v643_v44, %v642_v42 }
  0x2a   :  { %497 = vrot.lane.b32.xlu1 %v1194_v5, %s1316_s20  ;;  %v1189_v57 = vpack.c.bf16 %v327_v54, %v746_v51  ;;  %v1190_v58 = vpack.c.bf16 %v329_v56, %v328_v55  ;;  %v431_v59 = vld [vmem:[#allocation2 + $0x141] sm:$0xff]  ;;  %v432_v60 = vld [vmem:[#allocation2 + $0x159] sm:$0xff]  ;;  %v433_v61 = vld [vmem:[#allocation2 + $0x171] sm:$0xff]  ;;  %v1221_v11 = vpack.c.bf16 %v328_v55, %v327_v54 }
  0x2b   :  { %312 = vst.msk [vmem:[#allocation3 + $0x30] sm:$0xff] %vm170_vm0, %v1181_v46  ;;  %313 = vst.msk [vmem:[#allocation3 + $0x38] sm:$0xff] %vm170_vm0, %v1182_v48  ;;  %v434_v62 = vld [vmem:[#allocation2 + $0x189] sm:$0xff]  ;;  %v1197_v63 = vpack.c.bf16 %v432_v60, %v431_v59  ;;  %v537_v2 = vld [vmem:[#allocation2 + $0x15a] sm:$0xff] }
  0x2c   :  { %v1198_v0 = vpack.c.bf16 %v434_v62, %v433_v61  ;;  %v536_v1 = vld [vmem:[#allocation2 + $0x142] sm:$0xff]  ;;  %v539_v4 = vld [vmem:[#allocation2 + $0x18a] sm:$0xff]  ;;  %v645_v7 = vld [vmem:[#allocation2 + $0x198] sm:$0xff]  ;;  %v1320_v61 = vmov 0.0  }
  0x2d   :  { %600 = vrot.lane.b32.xlu0 %v1201_v13, %s1317_s21  ;;  %v1205_v5 = vpack.c.bf16 %v537_v2, %v536_v1  ;;  %v1206_v6 = vpack.c.bf16 %v539_v4, %v538_v3  ;;  %v1214_v9 = vpack.c.bf16 %v645_v7, %v644_v45  ;;  %v750_v10 = vld [vmem:[#allocation2 + $0x199] sm:$0xff]  ;;  %60 = vst [vmem:[%s1733_s3] sm:$0x1] %v1320_v61  ;;  %61 = vst [vmem:[%s1734_s4] sm:$0x1] %v1320_v61 }
  0x2e   :  { %602 = vrot.lane.b32.xlu1 %v1202_v17, %s1317_s21  ;;  %v1222_v12 = vpack.c.bf16 %v750_v10, %v329_v56 }
  0x31   :  { %706 = vrot.lane.b32.xlu0 %v1209_v20, %s1318_s22 }
  0x32   :  { %708 = vrot.lane.b32.xlu1 %v1210_v21, %s1318_s22 }
  0x35   :  { %811 = vrot.lane.b32.xlu0 %v1217_v23, %s1319_s7 }
  0x36   :  { %813 = vrot.lane.b32.xlu1 %v1218_v24, %s1319_s7 }
  0x39   :  { %394 = vrot.lane.b32.xlu0 %v1187_v29, %s1315_s19 }
  0x3a   :  { %396 = vrot.lane.b32.xlu1 %v1188_v30, %s1315_s19 }
  0x3d   :  { %499 = vrot.lane.b32.xlu0 %v1195_v35, %s1316_s20 }
  0x3e   :  { %501 = vrot.lane.b32.xlu1 %v1196_v36, %s1316_s20 }
  0x41   :  { %604 = vrot.lane.b32.xlu0 %v1203_v43, %s1317_s21 }
  0x42   :  { %606 = vrot.lane.b32.xlu1 %v1204_v47, %s1317_s21 }
  0x45   :  { %710 = vrot.lane.b32.xlu0 %v1211_v49, %s1318_s22 }
  0x46   :  { %712 = vrot.lane.b32.xlu1 %v1212_v50, %s1318_s22 }
  0x49   :  { %815 = vrot.lane.b32.xlu0 %v1219_v52, %s1319_s7 }
  0x4a   :  { %817 = vrot.lane.b32.xlu1 %v1220_v53, %s1319_s7 }
  0x4d   :  { %398 = vrot.lane.b32.xlu0 %v1189_v57, %s1315_s19 }
  0x4e   :  { %400 = vrot.lane.b32.xlu1 %v1190_v58, %s1315_s19 }
  0x51   :  { %503 = vrot.lane.b32.xlu0 %v1197_v63, %s1316_s20 }
  0x52   :  { %505 = vrot.lane.b32.xlu1 %v1198_v0, %s1316_s20 }
  0x55   :  { %608 = vrot.lane.b32.xlu0 %v1205_v5, %s1317_s21 }
  0x56   :  { %610 = vrot.lane.b32.xlu1 %v1206_v6, %s1317_s21 }
  0x59   :  { %714 = vrot.lane.b32.xlu0 %v1213_v8, %s1318_s22 }
  0x5a   :  { %716 = vrot.lane.b32.xlu1 %v1214_v9, %s1318_s22 }
  0x5d   :  { %819 = vrot.lane.b32.xlu0 %v1221_v11, %s1319_s7 }
  0x5e   :  { %821 = vrot.lane.b32.xlu1 %v1222_v12, %s1319_s7 }
  0x83   :  { %v387_v13 = vpop.permute.xlu0 %386 }
  0x84   :  { %411 = vst.msk [vmem:[#allocation3] sm:$0xff] %vm410_vm2, %v387_v13  ;;  %v492_v14 = vpop.permute.xlu1 %491 }
  0x85   :  { %516 = vst.msk [vmem:[#allocation3] sm:$0xff] %vm515_vm3, %v492_v14 }
  0x87   :  { %v389_v15 = vpop.permute.xlu0 %388 }
  0x88   :  { %412 = vst.msk [vmem:[#allocation3 + $0x8] sm:$0xff] %vm410_vm2, %v389_v15  ;;  %v494_v16 = vpop.permute.xlu1 %493 }
  0x89   :  { %517 = vst.msk [vmem:[#allocation3 + $0x8] sm:$0xff] %vm515_vm3, %v494_v16 }
  0x8b   :  { %v597_v17 = vpop.permute.xlu0 %596 }
  0x8c   :  { %621 = vst.msk [vmem:[#allocation3] sm:$0xff] %vm620_vm4, %v597_v17  ;;  %v599_v18 = vpop.permute.xlu1 %598 }
  0x8d   :  { %622 = vst.msk [vmem:[#allocation3 + $0x8] sm:$0xff] %vm620_vm4, %v599_v18 }
  0x8f   :  { %v703_v19 = vpop.permute.xlu0 %702 }
  0x90   :  { %727 = vst.msk [vmem:[#allocation3] sm:$0xff] %vm726_vm5, %v703_v19  ;;  %v705_v20 = vpop.permute.xlu1 %704 }
  0x91   :  { %728 = vst.msk [vmem:[#allocation3 + $0x8] sm:$0xff] %vm726_vm5, %v705_v20 }
  0x93   :  { %v808_v21 = vpop.permute.xlu0 %807 }
  0x94   :  { %832 = vst.msk [vmem:[#allocation3] sm:$0xff] %vm831_vm6, %v808_v21  ;;  %v810_v22 = vpop.permute.xlu1 %809 }
  0x95   :  { %833 = vst.msk [vmem:[#allocation3 + $0x8] sm:$0xff] %vm831_vm6, %v810_v22 }
  0x97   :  { %v391_v23 = vpop.permute.xlu0 %390 }
  0x98   :  { %413 = vst.msk [vmem:[#allocation3 + $0x10] sm:$0xff] %vm410_vm2, %v391_v23  ;;  %v393_v24 = vpop.permute.xlu1 %392 }
  0x99   :  { %414 = vst.msk [vmem:[#allocation3 + $0x18] sm:$0xff] %vm410_vm2, %v393_v24 }
  0x9b   :  { %v496_v25 = vpop.permute.xlu0 %495  ;;  %v840_v26 = vld [vmem:[#allocation3] sm:$0xff] }
  0x9c   :  { %518 = vst.msk [vmem:[#allocation3 + $0x10] sm:$0xff] %vm515_vm3, %v496_v25  ;;  %v498_v27 = vpop.permute.xlu1 %497  ;;  %1284 = vmatprep.mubr.msk.bf16.mxu0 %vm872_vm7, %v840_v26  ;;  %v841_v28 = vld [vmem:[#allocation3 + $0x8] sm:$0xff] }
  0x9d   :  { %519 = vst.msk [vmem:[#allocation3 + $0x18] sm:$0xff] %vm515_vm3, %v498_v27  ;;  %1285 = vmatmul.mubr.msk.bf16.vlgmr.msra.gmra.mrb[0].mxu0 %vm872_vm7, %v841_v28 }
  0x9f   :  { %v601_v29 = vpop.permute.xlu0 %600 }
  0xa0   :  { %623 = vst.msk [vmem:[#allocation3 + $0x10] sm:$0xff] %vm620_vm4, %v601_v29  ;;  %v603_v30 = vpop.permute.xlu1 %602 }
  0xa1   :  { %624 = vst.msk [vmem:[#allocation3 + $0x18] sm:$0xff] %vm620_vm4, %v603_v30 }
  0xa3   :  { %v707_v31 = vpop.permute.xlu0 %706 }
  0xa4   :  { %729 = vst.msk [vmem:[#allocation3 + $0x10] sm:$0xff] %vm726_vm5, %v707_v31  ;;  %v709_v32 = vpop.permute.xlu1 %708 }
  0xa5   :  { %730 = vst.msk [vmem:[#allocation3 + $0x18] sm:$0xff] %vm726_vm5, %v709_v32 }
  0xa7   :  { %v812_v33 = vpop.permute.xlu0 %811 }
  0xa8   :  { %834 = vst.msk [vmem:[#allocation3 + $0x10] sm:$0xff] %vm831_vm6, %v812_v33  ;;  %v814_v34 = vpop.permute.xlu1 %813 }
  0xa9   :  { %835 = vst.msk [vmem:[#allocation3 + $0x18] sm:$0xff] %vm831_vm6, %v814_v34 }
  0xab   :  { %v395_v35 = vpop.permute.xlu0 %394 }
  0xac   :  { %415 = vst.msk [vmem:[#allocation3 + $0x20] sm:$0xff] %vm410_vm2, %v395_v35  ;;  %v397_v36 = vpop.permute.xlu1 %396 }
  0xad   :  { %416 = vst.msk [vmem:[#allocation3 + $0x28] sm:$0xff] %vm410_vm2, %v397_v36 }
  0xaf   :  { %v500_v37 = vpop.permute.xlu0 %499  ;;  %v842_v38 = vld [vmem:[#allocation3 + $0x10] sm:$0xff] }
  0xb0   :  { %520 = vst.msk [vmem:[#allocation3 + $0x20] sm:$0xff] %vm515_vm3, %v500_v37  ;;  %v502_v39 = vpop.permute.xlu1 %501  ;;  %1288 = vmatprep.mubr.msk.bf16.mxu0 %vm872_vm7, %v842_v38  ;;  %v843_v40 = vld [vmem:[#allocation3 + $0x18] sm:$0xff] }
  0xb1   :  { %521 = vst.msk [vmem:[#allocation3 + $0x28] sm:$0xff] %vm515_vm3, %v502_v39  ;;  %1289 = vmatmul.mubr.msk.bf16.gmra.mrb[4].mxu0 %vm872_vm7, %v843_v40 }
  0xb3   :  { %v605_v41 = vpop.permute.xlu0 %604 }
  0xb4   :  { %625 = vst.msk [vmem:[#allocation3 + $0x20] sm:$0xff] %vm620_vm4, %v605_v41  ;;  %v607_v42 = vpop.permute.xlu1 %606 }
  0xb5   :  { %626 = vst.msk [vmem:[#allocation3 + $0x28] sm:$0xff] %vm620_vm4, %v607_v42 }
  0xb7   :  { %v711_v43 = vpop.permute.xlu0 %710 }
  0xb8   :  { %731 = vst.msk [vmem:[#allocation3 + $0x20] sm:$0xff] %vm726_vm5, %v711_v43  ;;  %v713_v44 = vpop.permute.xlu1 %712 }
  0xb9   :  { %732 = vst.msk [vmem:[#allocation3 + $0x28] sm:$0xff] %vm726_vm5, %v713_v44 }
  0xbb   :  { %v816_v45 = vpop.permute.xlu0 %815 }
  0xbc   :  { %836 = vst.msk [vmem:[#allocation3 + $0x20] sm:$0xff] %vm831_vm6, %v816_v45  ;;  %v818_v46 = vpop.permute.xlu1 %817 }
  0xbd   :  { %837 = vst.msk [vmem:[#allocation3 + $0x28] sm:$0xff] %vm831_vm6, %v818_v46 }
  0xbf   :  { %v399_v47 = vpop.permute.xlu0 %398 }
  0xc0   :  { %417 = vst.msk [vmem:[#allocation3 + $0x30] sm:$0xff] %vm410_vm2, %v399_v47  ;;  %v401_v48 = vpop.permute.xlu1 %400 }
  0xc1   :  { %418 = vst.msk [vmem:[#allocation3 + $0x38] sm:$0xff] %vm410_vm2, %v401_v48 }
  0xc3   :  { %v504_v49 = vpop.permute.xlu0 %503  ;;  %v844_v50 = vld [vmem:[#allocation3 + $0x20] sm:$0xff] }
  0xc4   :  { %522 = vst.msk [vmem:[#allocation3 + $0x30] sm:$0xff] %vm515_vm3, %v504_v49  ;;  %v506_v51 = vpop.permute.xlu1 %505  ;;  %1292 = vmatprep.mubr.msk.bf16.mxu1 %vm872_vm7, %v844_v50  ;;  %v845_v52 = vld [vmem:[#allocation3 + $0x28] sm:$0xff] }
  0xc5   :  { %523 = vst.msk [vmem:[#allocation3 + $0x38] sm:$0xff] %vm515_vm3, %v506_v51  ;;  %1293 = vmatmul.mubr.msk.bf16.vlgmr.msra.gmra.mrb[0].mxu1 %vm872_vm7, %v845_v52 }
  0xc7   :  { %v609_v53 = vpop.permute.xlu0 %608 }
  0xc8   :  { %627 = vst.msk [vmem:[#allocation3 + $0x30] sm:$0xff] %vm620_vm4, %v609_v53  ;;  %v611_v54 = vpop.permute.xlu1 %610 }
  0xc9   :  { %628 = vst.msk [vmem:[#allocation3 + $0x38] sm:$0xff] %vm620_vm4, %v611_v54 }
  0xcb   :  { %v715_v55 = vpop.permute.xlu0 %714 }
  0xcc   :  { %733 = vst.msk [vmem:[#allocation3 + $0x30] sm:$0xff] %vm726_vm5, %v715_v55  ;;  %v717_v56 = vpop.permute.xlu1 %716 }
  0xcd   :  { %734 = vst.msk [vmem:[#allocation3 + $0x38] sm:$0xff] %vm726_vm5, %v717_v56 }
  0xcf   :  { %v820_v57 = vpop.permute.xlu0 %819 }
  0xd0   :  { %838 = vst.msk [vmem:[#allocation3 + $0x30] sm:$0xff] %vm831_vm6, %v820_v57  ;;  %v822_v58 = vpop.permute.xlu1 %821 }
  0xd1   :  { %839 = vst.msk [vmem:[#allocation3 + $0x38] sm:$0xff] %vm831_vm6, %v822_v58 }
  0xd7   :  { %v846_v59 = vld [vmem:[#allocation3 + $0x30] sm:$0xff] }
  0xd8   :  { %1296 = vmatprep.mubr.msk.bf16.mxu1 %vm872_vm7, %v846_v59  ;;  %v847_v60 = vld [vmem:[#allocation3 + $0x38] sm:$0xff] }
  0xd9   :  { %1297 = vmatmul.mubr.msk.bf16.gmra.mrb[4].mxu1 %vm872_vm7, %v847_v60 }
 0x170   :  { %v1286_v62 = vpop.f32.mrb[0].mxu0 }
 0x171   :  { %1060 = vst.msk [vmem:[%s1735_s2 + $0x10] sm:$0xff] %vm170_vm0, %v1286_v62  ;;  %v931_v63 = vpop.f32.mrb[1].mxu0  ;;  %v1021_v5 = vmul.f32 %v1286_v62, %v1286_v62 }
 0x172   :  { %1058 = vst.msk [vmem:[%s1735_s2] sm:$0xff] %vm170_vm0, %v931_v63  ;;  %v1287_v0 = vpop.f32.mrb[2].mxu0  ;;  %v1019_v2 = vmul.f32 %v931_v63, %v931_v63 }
 0x173   :  { %1061 = vst.msk [vmem:[%s1735_s2 + $0x18] sm:$0xff] %vm170_vm0, %v1287_v0  ;;  %v934_v1 = vpop.f32.mrb[3].mxu0  ;;  %v1022_v8 = vmul.f32 %v1287_v0, %v1287_v0 }
 0x174   :  { %v995_v3 = vadd.f32 %v934_v1, %v931_v63  ;;  %v1020_v4 = vmul.f32 %v934_v1, %v934_v1  ;;  %1059 = vst.msk [vmem:[%s1735_s2 + $0x8] sm:$0xff] %vm170_vm0, %v934_v1 }
 0x176   :  { %v996_v6 = vadd.f32 %v1286_v62, %v995_v3  ;;  %v1035_v7 = vadd.f32 %v1020_v4, %v1019_v2 }
 0x178   :  { %v1036_v9 = vadd.f32 %v1035_v7, %v1021_v5  ;;  %v997_v10 = vadd.f32 %v1287_v0, %v996_v6  ;;  %v994_v5 = vld [vmem:[%s1733_s3] sm:$0x1] }
 0x17a   :  { %v1037_v11 = vadd.f32 %v1036_v9, %v1022_v8  ;;  %v1018_v8 = vld [vmem:[%s1734_s4] sm:$0x1] }
 0x184   :  { %v1290_v12 = vpop.f32.mrb[4].mxu0 }
 0x185   :  { %1064 = vst.msk [vmem:[%s1735_s2 + $0x30] sm:$0xff] %vm170_vm0, %v1290_v12  ;;  %v947_v13 = vpop.f32.mrb[5].mxu0  ;;  %v1025_v21 = vmul.f32 %v1290_v12, %v1290_v12 }
 0x186   :  { %v998_v14 = vadd.f32 %v997_v10, %v947_v13  ;;  %v1023_v15 = vmul.f32 %v947_v13, %v947_v13  ;;  %1062 = vst.msk [vmem:[%s1735_s2 + $0x20] sm:$0xff] %vm170_vm0, %v947_v13  ;;  %v1291_v16 = vpop.f32.mrb[6].mxu0 }
 0x187   :  { %1065 = vst.msk [vmem:[%s1735_s2 + $0x38] sm:$0xff] %vm170_vm0, %v1291_v16  ;;  %v950_v17 = vpop.f32.mrb[7].mxu0  ;;  %v1026_v24 = vmul.f32 %v1291_v16, %v1291_v16 }
 0x188   :  { %v1038_v18 = vadd.f32 %v1037_v11, %v1023_v15  ;;  %v999_v19 = vadd.f32 %v998_v14, %v950_v17  ;;  %v1024_v20 = vmul.f32 %v950_v17, %v950_v17  ;;  %1063 = vst.msk [vmem:[%s1735_s2 + $0x28] sm:$0xff] %vm170_vm0, %v950_v17 }
 0x18a   :  { %v1000_v22 = vadd.f32 %v1290_v12, %v999_v19  ;;  %v1039_v23 = vadd.f32 %v1038_v18, %v1024_v20 }
 0x18c   :  { %v1040_v25 = vadd.f32 %v1039_v23, %v1025_v21  ;;  %v1001_v26 = vadd.f32 %v1291_v16, %v1000_v22 }
 0x18e   :  { %v1041_v27 = vadd.f32 %v1040_v25, %v1026_v24 }
 0x198   :  { %v1294_v28 = vpop.f32.mrb[0].mxu1 }
 0x199   :  { %1068 = vst.msk [vmem:[%s1735_s2 + $0x50] sm:$0xff] %vm170_vm0, %v1294_v28  ;;  %v963_v29 = vpop.f32.mrb[1].mxu1  ;;  %v1029_v37 = vmul.f32 %v1294_v28, %v1294_v28 }
 0x19a   :  { %v1002_v30 = vadd.f32 %v1001_v26, %v963_v29  ;;  %v1027_v31 = vmul.f32 %v963_v29, %v963_v29  ;;  %1066 = vst.msk [vmem:[%s1735_s2 + $0x40] sm:$0xff] %vm170_vm0, %v963_v29  ;;  %v1295_v32 = vpop.f32.mrb[2].mxu1 }
 0x19b   :  { %1069 = vst.msk [vmem:[%s1735_s2 + $0x58] sm:$0xff] %vm170_vm0, %v1295_v32  ;;  %v966_v33 = vpop.f32.mrb[3].mxu1  ;;  %v1030_v40 = vmul.f32 %v1295_v32, %v1295_v32 }
 0x19c   :  { %v1042_v34 = vadd.f32 %v1041_v27, %v1027_v31  ;;  %v1003_v35 = vadd.f32 %v1002_v30, %v966_v33  ;;  %v1028_v36 = vmul.f32 %v966_v33, %v966_v33  ;;  %1067 = vst.msk [vmem:[%s1735_s2 + $0x48] sm:$0xff] %vm170_vm0, %v966_v33 }
 0x19e   :  { %v1004_v38 = vadd.f32 %v1294_v28, %v1003_v35  ;;  %v1043_v39 = vadd.f32 %v1042_v34, %v1028_v36 }
 0x1a0   :  { %v1044_v41 = vadd.f32 %v1043_v39, %v1029_v37  ;;  %v1005_v42 = vadd.f32 %v1295_v32, %v1004_v38 }
 0x1a2   :  { %v1045_v43 = vadd.f32 %v1044_v41, %v1030_v40 }
 0x1ac   :  { %v1298_v44 = vpop.f32.mrb[4].mxu1 }
 0x1ad   :  { %1072 = vst.msk [vmem:[%s1735_s2 + $0x70] sm:$0xff] %vm170_vm0, %v1298_v44  ;;  %v979_v45 = vpop.f32.mrb[5].mxu1  ;;  %v1033_v53 = vmul.f32 %v1298_v44, %v1298_v44 }
 0x1ae   :  { %v1006_v46 = vadd.f32 %v1005_v42, %v979_v45  ;;  %v1031_v47 = vmul.f32 %v979_v45, %v979_v45  ;;  %1070 = vst.msk [vmem:[%s1735_s2 + $0x60] sm:$0xff] %vm170_vm0, %v979_v45  ;;  %v1299_v48 = vpop.f32.mrb[6].mxu1 }
 0x1af   :  { %1073 = vst.msk [vmem:[%s1735_s2 + $0x78] sm:$0xff] %vm170_vm0, %v1299_v48  ;;  %v982_v49 = vpop.f32.mrb[7].mxu1  ;;  %v1034_v56 = vmul.f32 %v1299_v48, %v1299_v48 }
 0x1b0   :  { %v1046_v50 = vadd.f32 %v1045_v43, %v1031_v47  ;;  %v1007_v51 = vadd.f32 %v1006_v46, %v982_v49  ;;  %v1032_v52 = vmul.f32 %v982_v49, %v982_v49  ;;  %1071 = vst.msk [vmem:[%s1735_s2 + $0x68] sm:$0xff] %vm170_vm0, %v982_v49 }
 0x1b2   :  { %v1008_v54 = vadd.f32 %v1298_v44, %v1007_v51  ;;  %v1047_v55 = vadd.f32 %v1046_v50, %v1032_v52 }
 0x1b4   :  { %v1009_v57 = vadd.f32 %v1299_v48, %v1008_v54  ;;  %v1048_v58 = vadd.f32 %v1047_v55, %v1033_v53 }
 0x1b6   :  { %v1010_v59 = vrot.slane %v1009_v57, 4  ;;  %v1049_v60 = vadd.f32 %v1048_v58, %v1034_v56 }
 0x1b8   :  { %v1011_v61 = vadd.f32 %v1010_v59, %v1009_v57  ;;  %v1050_v62 = vrot.slane %v1049_v60, 4 }
 0x1ba   :  { %v1012_v63 = vrot.slane %v1011_v61, 2  ;;  %v1051_v0 = vadd.f32 %v1050_v62, %v1049_v60 }
 0x1bc   :  { %v1013_v1 = vadd.f32 %v1012_v63, %v1011_v61  ;;  %v1052_v2 = vrot.slane %v1051_v0, 2 }
 0x1be   :  { %v1014_v3 = vrot.slane %v1013_v1, 1  ;;  %v1053_v4 = vadd.f32 %v1052_v2, %v1051_v0 }
 0x1c0   :  { %v1015_v6 = vadd.f32 %v1014_v3, %v1013_v1  ;;  %v1054_v7 = vrot.slane %v1053_v4, 1 }
 0x1c2   :  { %v1016_v9 = vadd.f32 %v1015_v6, %v994_v5  ;;  %v1055_v10 = vadd.f32 %v1054_v7, %v1053_v4 }
 0x1c4   :  { %1017 = vst [vmem:[%s1733_s3] sm:$0x1] %v1016_v9  ;;  %v1056_v11 = vadd.f32 %v1055_v10, %v1018_v8 }
 0x1c6   :  { %1057 = vst [vmem:[%s1734_s4] sm:$0x1] %v1056_v11 }

</bundles_post_ra>
